<compile_context>
chip_gen: v7x
topology: tpu7x:2x2x1
jax: 0.10.0
libtpu: 0.0.40
codegen_flags: <defaults>
</compile_context>

<pallas_src>
import functools

import jax
import jax.numpy as jnp
from jax.experimental import pallas as pl
from jax.experimental.pallas import tpu as pltpu


# ---------------------------------------------------------------------------
# Kernel 1: one N-tile of y = relu?(x @ W + b), full K contraction per step.
# ---------------------------------------------------------------------------
def _linear_kernel(x_ref, w_ref, b_ref, o_ref, *, apply_relu: bool):
    acc = jnp.dot(x_ref[...], w_ref[...], preferred_element_type=jnp.float32)
    out = acc + b_ref[...]
    if apply_relu:
        out = jnp.maximum(out, 0.0)
    o_ref[...] = out.astype(o_ref.dtype)


def pallas_linear(x, w, b, *, apply_relu: bool):
    """y = relu?(x @ w + b).  x:(B,K), w:(K,N) bf16-streamed, b:(N,) f32."""
    B, K = x.shape
    K2, N = w.shape
    assert K == K2

    x = x.astype(jnp.bfloat16)
    w = w.astype(jnp.bfloat16)
    b2d = b.reshape(1, N).astype(jnp.float32)

    # Largest lane-aligned N tile that divides N (2048-wide layers -> tn=1024,
    # giving 2 parallel grid steps so v7x's 2 TensorCores both get work).
    tn = N
    for cand in (1024, 512, 256, 128):
        if N % cand == 0:
            tn = cand
            break

    grid = (N // tn,)
    kernel = functools.partial(_linear_kernel, apply_relu=apply_relu)

    return pl.pallas_call(
        kernel,
        out_shape=jax.ShapeDtypeStruct((B, N), jnp.bfloat16),
        grid_spec=pltpu.PrefetchScalarGridSpec(
            num_scalar_prefetch=0,
            grid=grid,
            in_specs=[
                pl.BlockSpec((B, K), lambda j: (0, 0)),   # activations (tiny)
                pl.BlockSpec((K, tn), lambda j: (0, j)),  # streamed weight tile
                pl.BlockSpec((1, tn), lambda j: (0, j)),  # bias tile
            ],
            out_specs=pl.BlockSpec((B, tn), lambda j: (0, j)),
        ),
        compiler_params=pltpu.CompilerParams(
            dimension_semantics=("parallel",),
            vmem_limit_bytes=32 * 1024 * 1024,
        ),
    )(x, w, b2d)


# ---------------------------------------------------------------------------
# Kernel 2: fused tail  fc3 -> relu -> fc4 -> relu -> fc5  in one launch.
# All three weight sets fit VMEM comfortably (~4.2 MB bf16), so no tiling.
# ---------------------------------------------------------------------------
def _tail_kernel(x_ref, w3_ref, b3_ref, w4_ref, b4_ref, w5_ref, b5_ref, o_ref):
    h3 = jnp.dot(x_ref[...], w3_ref[...], preferred_element_type=jnp.float32)
    h3 = jnp.maximum(h3 + b3_ref[...], 0.0)

    h4 = jnp.dot(h3.astype(w4_ref.dtype), w4_ref[...],
                 preferred_element_type=jnp.float32)
    h4 = jnp.maximum(h4 + b4_ref[...], 0.0)

    h5 = jnp.dot(h4.astype(w5_ref.dtype), w5_ref[...],
                 preferred_element_type=jnp.float32)
    o_ref[...] = (h5 + b5_ref[...]).astype(o_ref.dtype)


def pallas_mlp_tail(x, w3, b3, w4, b4, w5, b5):
    B, K = x.shape
    N3 = w3.shape[1]
    N4 = w4.shape[1]
    N5 = w5.shape[1]

    x = x.astype(jnp.bfloat16)
    w3 = w3.astype(jnp.bfloat16)
    w4 = w4.astype(jnp.bfloat16)
    w5 = w5.astype(jnp.bfloat16)
    b3 = b3.reshape(1, N3).astype(jnp.float32)
    b4 = b4.reshape(1, N4).astype(jnp.float32)
    b5 = b5.reshape(1, N5).astype(jnp.float32)

    return pl.pallas_call(
        _tail_kernel,
        out_shape=jax.ShapeDtypeStruct((B, N5), jnp.float32),
        grid_spec=pltpu.PrefetchScalarGridSpec(
            num_scalar_prefetch=0,
            grid=(1,),
            in_specs=[
                pl.BlockSpec((B, K), lambda i: (0, 0)),
                pl.BlockSpec((K, N3), lambda i: (0, 0)),
                pl.BlockSpec((1, N3), lambda i: (0, 0)),
                pl.BlockSpec((N3, N4), lambda i: (0, 0)),
                pl.BlockSpec((1, N4), lambda i: (0, 0)),
                pl.BlockSpec((N4, N5), lambda i: (0, 0)),
                pl.BlockSpec((1, N5), lambda i: (0, 0)),
            ],
            out_specs=pl.BlockSpec((B, N5), lambda i: (0, 0)),
        ),
        compiler_params=pltpu.CompilerParams(
            dimension_semantics=("arbitrary",),
            vmem_limit_bytes=32 * 1024 * 1024,
        ),
    )(x, w3, b3, w4, b4, w5, b5)


# ---------------------------------------------------------------------------
# Parameters & forward pass (matches the PyTorch module's architecture).
# ---------------------------------------------------------------------------
def init_params(key, in_ch: int, num_cls: int):
    """Deterministic synthetic parameters; weights stored as (in, out) = W.T."""
    dims = [in_ch, 2048, 2048, 1024, 64, num_cls]
    params = []
    for i in range(5):
        key, wk, bk = jax.random.split(key, 3)
        fan_in = dims[i]
        bound = 1.0 / (fan_in ** 0.5)
        w = jax.random.uniform(
            wk, (dims[i], dims[i + 1]), jnp.float32, -bound, bound
        )
        b = jax.random.uniform(bk, (dims[i + 1],), jnp.float32, -bound, bound)
        params.append((w, b))
    return params


def mlp_encoder_forward(x_nchw, params):
    B = x_nchw.shape[0]
    x = x_nchw.reshape(B, -1)                       # nn.Flatten()
    (w1, b1), (w2, b2), (w3, b3), (w4, b4), (w5, b5) = params
    x = pallas_linear(x, w1, b1, apply_relu=True)   # fc1 + relu1
    x = pallas_linear(x, w2, b2, apply_relu=True)   # fc2 + relu2
    x = pallas_mlp_tail(x, w3, b3, w4, b4, w5, b5)  # fc3..fc5 fused
    return x


if __name__ == "__main__":
    key = jax.random.PRNGKey(0)
    kx, kp = jax.random.split(key)

    B, C, H, W = 2, 4, 16, 16          # in_ch = C*H*W = 1024
    num_cls = 10

    x = jax.random.normal(kx, (B, C, H, W), jnp.float32)
    params = init_params(kp, C * H * W, num_cls)

    out = mlp_encoder_forward(x, params)
    out = jax.block_until_ready(out)

    assert out.shape == (B, num_cls)
    assert bool(jnp.all(jnp.isfinite(out)))
    print("KERNEL_OK")
</pallas_src>

<mosaic_0001>
module attributes {stable_mosaic.version = 11 : i64} {
  func.func @_linear_kernel(%arg0: i32, %arg1: memref<2x1024xbf16, #tpu.memory_space<vmem>>, %arg2: memref<1024x1024xbf16, #tpu.memory_space<vmem>>, %arg3: memref<1x1024xf32, #tpu.memory_space<vmem>>, %arg4: memref<2x1024xbf16, #tpu.memory_space<vmem>>) attributes {dimension_semantics = [#tpu.dimension_semantics<parallel>], iteration_bounds = array<i64: 2>, scalar_prefetch = 0 : i64, scratch_operands = 0 : i64, tpu.core_type = #tpu.core_type<tc>, window_params = [{pipeline_mode = #tpu.pipeline_mode<synchronous>, transform_indices = @transform_0, window_bounds = array<i64: 2, 1024>}, {transform_indices = @transform_1, window_bounds = array<i64: 1024, 1024>}, {transform_indices = @transform_2, window_bounds = array<i64: 1, 1024>}, {transform_indices = @transform_3, window_bounds = array<i64: 2, 1024>}]} {
    %c0 = arith.constant 0 : index
    %c0_0 = arith.constant 0 : index
    %0 = vector.load %arg1[%c0, %c0_0] : memref<2x1024xbf16, #tpu.memory_space<vmem>>, vector<2x1024xbf16>
    %c0_1 = arith.constant 0 : index
    %c0_2 = arith.constant 0 : index
    %1 = vector.load %arg2[%c0_1, %c0_2] : memref<1024x1024xbf16, #tpu.memory_space<vmem>>, vector<1024x1024xbf16>
    %cst = arith.constant dense<0.000000e+00> : vector<2x1024xf32>
    %2 = tpu.matmul %0, %1, %cst {dimension_numbers = #tpu.dot_dimension_numbers<[1], [0], [0], [1], [0, 0, 1, 1], [], []>} : vector<2x1024xbf16>, vector<1024x1024xbf16>, vector<2x1024xf32> -> vector<2x1024xf32>
    %c0_3 = arith.constant 0 : index
    %c0_4 = arith.constant 0 : index
    %3 = vector.load %arg3[%c0_3, %c0_4] : memref<1x1024xf32, #tpu.memory_space<vmem>>, vector<1x1024xf32>
    %4 = vector.broadcast %3 : vector<1x1024xf32> to vector<2x1024xf32>
    %5 = arith.addf %2, %4 : vector<2x1024xf32>
    %cst_5 = arith.constant 0.000000e+00 : f32
    %6 = vector.broadcast %cst_5 : f32 to vector<2x1024xf32>
    %7 = arith.maximumf %5, %6 : vector<2x1024xf32>
    %8 = arith.truncf %7 : vector<2x1024xf32> to vector<2x1024xbf16>
    %c0_6 = arith.constant 0 : index
    %c0_7 = arith.constant 0 : index
    %9 = vector.load %arg4[%c0_6, %c0_7] : memref<2x1024xbf16, #tpu.memory_space<vmem>>, vector<2x1024xbf16>
    tpu.vector_store %arg4[%c0_6, %c0_7], %8 {strides = array<i32>} : memref<2x1024xbf16, #tpu.memory_space<vmem>>, vector<2x1024xbf16>,
    return
  }
  func.func @transform_0(%arg0: i32) -> (i32, i32) {
    %c0_i32 = arith.constant 0 : i32
    %c0_i32_0 = arith.constant 0 : i32
    %c0_i32_1 = arith.constant 0 : i32
    return %c0_i32, %c0_i32_0 : i32, i32
  }
  func.func @transform_1(%arg0: i32) -> (i32, i32) {
    %c0_i32 = arith.constant 0 : i32
    %c0_i32_0 = arith.constant 0 : i32
    return %c0_i32, %arg0 : i32, i32
  }
  func.func @transform_2(%arg0: i32) -> (i32, i32) {
    %c0_i32 = arith.constant 0 : i32
    %c0_i32_0 = arith.constant 0 : i32
    return %c0_i32, %arg0 : i32, i32
  }
  func.func @transform_3(%arg0: i32) -> (i32, i32) {
    %c0_i32 = arith.constant 0 : i32
    %c0_i32_0 = arith.constant 0 : i32
    return %c0_i32, %arg0 : i32, i32
  }
}

</mosaic_0001>

<bundles_post_ra>
// kernel: tpu_custom_call.1
= control target key start
LH: loop header
LB: loop body
LE: loop exit
PB: predicated region body
PF: predicated region fallthrough
CT: control target
= control target key end

     0   :  { %8 = vsyncpa [#allocation3], 0  ;;  %s5972_s0 = inlined_call_operand.hbm [shape: bf16[2,1024], index: 0, kind: input, shape index: {}]   ;;  %s5973_s1 = inlined_call_operand.hbm [shape: bf16[1024,2048], index: 1, kind: input, shape index: {}]   ;;  %s5974_s2 = inlined_call_operand.hbm [shape: f32[1,2048], index: 2, kind: input, shape index: {}]   ;;  %s5975_s3 = inlined_call_operand.hbm [shape: bf16[2,2048], index: 3, kind: output, shape index: {}]  }
   0x1   :  { %9 = vsyncpa [#allocation6], 0 }
   0x2   :  { %11 = vsyncpa [#allocation6 + $0x1], 0 }
   0x3   :  { %12 = vsyncpa [#allocation4], 0 }
   0x4   :  { %14 = vsyncpa [#allocation4 + $0x1], 0  ;;  %s5111_s12 = smov 0   ;;  %s5113_s13 = smov 0  }
   0x5   :  { %s5115_s14 = smov 0   ;;  %s5117_s15 = smov 0  }
   0x6 LB: > { %s5132_s16 = sadd.s32 1, %s5081_s15   ;;  %s48_s17 = sadd.s32 1, %s5077_s14  ;;  %s5081_s15 = sphi %s5117_s15, %s6002_s15   ;;  %s5077_s14 = sphi %s5115_s14, %s6001_s14   ;;  %s5073_s13 = sphi %s5113_s13, %s6000_s13   ;;  %s5069_s12 = sphi %s5111_s12, %s5999_s12  }
   0x7   : > { %s45_s18 = ssub.s32 %s5081_s15, %s5132_s16  ;;  %p55_p0 = scmp.ne.s32.totalorder %s5077_s14, %s5073_s13 }
   0x8   : > { %p46_p1 = scmp.eq.s32.totalorder %s45_s18, 0  ;;  %p56_p2 = scmp.eq.s32.totalorder %s5081_s15, 0 }
   0x9   : > { %p4882_p4 = scmp.lt.s32.totalorder %s5081_s15, 2  ;;  %s148_s20 = sand.u32 1, %s5081_s15  }
   0xa   : > { %s5143_s19 = scalar_select %p46_p1, %s5077_s14, %s48_s17  }
   0xb   : > { %p57_p5 = por %p56_p2, %p55_p0  ;;  %s150_s21 = sand.u32 1, %s5077_s14  }
   0xc   : > { %s4265_s22 = sshll.u32 %s150_s21, 12  ;;  %s4797_s23 = sshll.u32 %s5081_s15, 9 }
   0xd   : > { %s5156_s26 = scalar_lea.hbm %s5973_s1, %s4797_s23  ;;  %s152_s27 = scalar_lea.vmem [#allocation5], %s4265_s22 }
   0xe   : > { %s159_s28 = sshll.u32 %s152_s27, 4  ;;  %p5158_p6 = pnand %p4882_p4, %p57_p5  ;;  %s5162_s28 = int_to_ptr.vmem [resolvable:$true] %s159_s28 }
   0xf   : > { %s5164_s30 = scalar_lea.sflag [#allocation6], %s148_s20  ;;  %s4923_s4 = scalar_lea.hbm %s5156_s26, 65536 }
  0x10   : > { %s5983_s29 = scalar_select %p5158_p6, 1, 0 }
  0x11   : > { %p4924_p7 = scmp.ne.s32.totalorder %s5156_s26, %s4923_s4  ;;  %p5977_p8 = pneg %p5158_p6 }
  0x12   : > { %s4928_s7 = scalar_lea.hbm %s5973_s1, 131072  ;;  %p4929_p11 = scmp.lt.u32.totalorder %s5156_s26, %s5973_s1 }
  0x13   : > { %p4926_p9 = pnand %p5977_p8, %p4924_p7  ;;  %p4930_p12 = scmp.lt.u32.totalorder %s4928_s7, %s4923_s4 }
  0x14   : > { %p4932_p1 = scmp.lt.u32.totalorder %s4923_s4, %s5156_s26 }
  0x15   : > { %p4927_p10 = pneg %p4926_p9  ;;  %p4931_p13 = por %p4930_p12, %p4929_p11 }
  0x17   : > { %p4933_p2 = por %p4932_p1, %p4931_p13 }
  0x19   : > { %p4934_p4 = pnand %p4933_p2, %p4927_p10 }
  0x1b   : > { %4937 = shalt.err (!%p4934_p4)
}
  0x1c   : > { %s4938_s10 = scalar_lea.vmem %s5162_s28, 65536  ;;  %s5083_s11 = smov [#allocation5]  }
  0x1d   : > { %p4939_p5 = scmp.ne.s32.totalorder %s5162_s28, %s4938_s10  ;;  %s4943_s17 = sshll.u32 %s5083_s11, 4  ;;  %s4944_s17 = int_to_ptr.vmem [resolvable:$false] %s4943_s17 }
  0x1e   : > { %s4945_s18 = scalar_lea.vmem %s4944_s17, 131072  ;;  %p4946_p3 = scmp.lt.s32.totalorder %s5162_s28, %s4944_s17 }
  0x1f   : > { %p4941_p7 = pnand %p4939_p5, %p5977_p8  ;;  %p4947_p11 = scmp.lt.s32.totalorder %s4945_s18, %s4938_s10 }
  0x21   : > { %p4942_p9 = pneg %p4941_p7  ;;  %p4948_p12 = por %p4947_p11, %p4946_p3 }
  0x23   : > { %p4949_p13 = pnand %p4948_p12, %p4942_p9 }
  0x25   : > { %4952 = shalt.err (!%p4949_p13)
}
  0x26   : > { %s5084_s20 = smov 1024   ;;  %s5085_s22 = smov 512  }
  0x27   : > { %s5086_s23 = smov 32   ;;  %s5193_s24 = sadd.s32 4294967295, %s5081_s15  }
  0x28   : > { %4873 = dma.hbm_to_vmem [thread:$0]  (!%p5158_p6), %s5156_s26, 65536, %s5162_s28, %s5164_s30, %s5084_s20, %s5085_s22, %s5086_s23  }
  0x29   : > { %s4261_s25 = sadd.s32 4294967294, %s5081_s15   ;;  %p61_p3 = scmp.ne.s32.totalorder %s5073_s13, %s5069_s12 }
  0x2a   : > { %p5976_p10 = scmp.eq.s32.totalorder %s5193_s24, 0  ;;  %p111_p1 = scmp.eq.s32.totalorder %s5193_s24, 1 }
  0x2b   : > { %p117_p2 = scmp.eq.s32.totalorder %s4261_s25, 1  ;;  %p4262_p4 = scmp.ge.s32.totalorder %s5081_s15, 1 }
  0x2c   : > { %p5203_p5 = por %p5976_p10, %p61_p3  ;;  %p5210_p7 = por %p111_p1, %p55_p0 }
  0x2d   : > { %p5214_p9 = por %p117_p2, %p61_p3  ;;  %p124_p11 = scmp.lt.s32.totalorder %s5081_s15, 3 }
  0x2e   : > { %s5984_s27 = scalar_select %p5203_p5, 1, 0 }
  0x2f   : > { %s5985_s26 = scalar_select %p5210_p7, 1, 0 }
  0x30   : > { %s5986_s28 = scalar_select %p5214_p9, 1, 0 }
  0x31   : > { %p5219_p12 = pnand %p4262_p4, %p124_p11  ;;  %s5087_s5 = smov [#allocation2]  }
  0x32   : > { %s137_s6 = sshll.u32 %s5087_s5, 4  ;;  %s4268_s7 = sshll.u32 %s150_s21, 3  ;;  %s138_s6 = int_to_ptr.vmem [resolvable:$true] %s137_s6 }
  0x33   : > { %s5987_s4 = scalar_select %p5219_p12, 1, 0 }
  0x34   : > { %p4866_p13 = pneg %p5219_p12  ;;  %s4798_s8 = sshll.u32 %s5081_s15, 7 }
  0x35   : > { %s173_s9 = scalar_lea.vmem [#allocation7], %s4268_s7  ;;  %s5237_s20 = scalar_lea.hbm %s5974_s2, %s4798_s8 }
  0x36   : > { %s181_s10 = sshll.u32 %s173_s9, 4  ;;  %p5230_p0 = pnand %p4866_p13, %p5976_p10  ;;  %s5239_s10 = int_to_ptr.vmem [resolvable:$true] %s181_s10 }
  0x37   : > { %s4953_s23 = scalar_lea.hbm %s5972_s0, 128 }
  0x38   : > { %p4954_p3 = scmp.ne.s32.totalorder %s5972_s0, %s4953_s23  ;;  %p4955_p1 = pneg %p5230_p0 }
  0x39   : > { %p4960_p11 = scmp.lt.u32.totalorder %s4953_s23, %s5972_s0 }
  0x3a   : > { %p4956_p2 = pnand %p4955_p1, %p4954_p3 }
  0x3c   : > { %p4957_p4 = pneg %p4956_p2 }
  0x3e   : > { %p4962_p13 = pnand %p4960_p11, %p4957_p4 }
  0x40   : > { %4965 = shalt.err (!%p4962_p13)
}
  0x41   : > { %s4966_s8 = scalar_lea.vmem %s138_s6, 128  ;;  %p4974_p7 = scmp.lt.s32.totalorder %s138_s6, %s138_s6 }
  0x42   : > { %p4967_p10 = scmp.ne.s32.totalorder %s138_s6, %s4966_s8  ;;  %p4975_p5 = scmp.lt.s32.totalorder %s4966_s8, %s4966_s8 }
  0x44   : > { %p4969_p8 = pnand %p4967_p10, %p4955_p1  ;;  %p4976_p12 = por %p4975_p5, %p4974_p7 }
  0x46   : > { %p4970_p9 = pneg %p4969_p8 }
  0x48   : > { %p4977_p6 = pnand %p4976_p12, %p4970_p9 }
  0x4a   : > { %4980 = shalt.err (!%p4977_p6)
}
  0x4b   : > { %4869 = dma.hbm_to_vmem [thread:$0]  (!%p5230_p0), %s5972_s0, 128, %s138_s6, [#allocation3]  }
  0x4c   : > { %s4981_s21 = scalar_lea.hbm %s5237_s20, 128  ;;  %p5989_p10 = scmp.ne.s32.totalorder %s5983_s29, 0 }
  0x4d   : > { %p4982_p3 = scmp.ne.s32.totalorder %s5237_s20, %s4981_s21  ;;  %s4986_s25 = scalar_lea.hbm %s5974_s2, 256 }
  0x4e   : > { %p5990_p8 = pneg %p5989_p10  ;;  %p4987_p6 = scmp.lt.u32.totalorder %s5237_s20, %s5974_s2 }
  0x4f   : > { %p4988_p5 = scmp.lt.u32.totalorder %s4986_s25, %s4981_s21  ;;  %p4990_p9 = scmp.lt.u32.totalorder %s4981_s21, %s5237_s20 }
  0x50   : > { %p4984_p1 = pnand %p4982_p3, %p5990_p8 }
  0x51   : > { %p4989_p7 = por %p4988_p5, %p4987_p6 }
  0x52   : > { %p4985_p2 = pneg %p4984_p1 }
  0x53   : > { %p4991_p12 = por %p4990_p9, %p4989_p7 }
  0x55   : > { %p4992_p4 = pnand %p4991_p12, %p4985_p2 }
  0x57   : > { %4995 = shalt.err (!%p4992_p4)
}
  0x58   : > { %s4996_s6 = scalar_lea.vmem %s5239_s10, 128  ;;  %p5991_p11 = pmov %p5990_p8 }
  0x59   : > { %p4997_p0 = scmp.ne.s32.totalorder %s5239_s10, %s4996_s6  ;;  %s5088_s7 = smov [#allocation7]  }
  0x5a   : > { %s5001_s9 = sshll.u32 %s5088_s7, 4  ;;  %s5002_s9 = int_to_ptr.vmem [resolvable:$false] %s5001_s9 }
  0x5b   : > { %p4999_p13 = pnand %p4997_p0, %p5991_p11  ;;  %s5003_s8 = scalar_lea.vmem %s5002_s9, 256 }
  0x5c   : > { %p5004_p8 = scmp.lt.s32.totalorder %s5239_s10, %s5002_s9  ;;  %p5005_p1 = scmp.lt.s32.totalorder %s5003_s8, %s4996_s6 }
  0x5d   : > { %p5000_p3 = pneg %p4999_p13 }
  0x5e   : > { %p5006_p6 = por %p5005_p1, %p5004_p8 }
  0x60   : > { %p5007_p5 = pnand %p5006_p6, %p5000_p3 }
  0x62   : > { %5010 = shalt.err (!%p5007_p5)
}
  0x63   : > { %4876 = dma.hbm_to_vmem [thread:$0]  (!%p5989_p10), %s5237_s20, 128, %s5239_s10, %s5164_s30  }
  0x64   : > { %p5992_p2 = scmp.ne.s32.totalorder %s5987_s4, 0 }
  0x65   : > { %p5993_p7 = scmp.eq.s32.totalorder (!%p5992_p2), %s5193_s24, 0 }
  0x66   : > { %190 = sbr.rel (%p5992_p2) target bundleno = 872 (0x368), region = 32 }
  0x6d   : > { %5056 = dma.done.wait (%p5993_p7), [#allocation3], 128   ;;  %p5994_p9 = pmov %p5993_p7 }
  0x6e   : > { %s196_s17 = sand.u32 1, %s5193_s24   ;;  %s5289_s18 = sand.u32 1, %s5073_s13  }
  0x6f   : > { %5058 = vsyncadd (%p5994_p9), [#allocation3], 4294967168  ;;  %s4273_s29 = sshll.u32 %s5289_s18, 12  ;;  %s197_s21 = scalar_lea.sflag [#allocation6], %s196_s17 }
  0x70   : > { %s5292_s22 = scalar_lea.vmem [#allocation5], %s4273_s29  ;;  %p5995_p10 = scmp.ne.s32.totalorder %s5984_s27, 0 }
  0x72   : > { %5060 = dma.done.wait (%p5995_p10), %s197_s21, 65664  }
  0x73   : > { %5062 = vsyncadd (%p5995_p10), %s197_s21, 4294901632  ;;  %v241_v0 = vld [vmem:[%s5292_s22] sm:$0xff]  ;;  %v242_v2 = vld [vmem:[%s5292_s22 + $0x8] sm:$0xff]  ;;  %v755_v32 = vlaneseq  ;;  %v5089_v33 = vmov 1966171168   ;;  %s4274_s30 = sshll.u32 %s5289_s18, 3 }
  0x74   : > { %v245_v1 = vld [vmem:[%s5292_s22 + $0x20] sm:$0xff]  ;;  %v246_v4 = vld [vmem:[%s5292_s22 + $0x28] sm:$0xff]  ;;  %v798_v34 = vunpack.c.l.s4 %v5089_v33  ;;  %v5331_v59 = vld [vmem:[#allocation2] sm:$0xff]  ;;  %s209_s27 = scalar_lea.vmem [#allocation7], %s4274_s30  ;;  %s4799_s4 = sshll.u32 %s5193_s24, 7 }
  0x75   : > { %v4277_v3 = vcombine.high %v241_v0, %v245_v1  ;;  %v4276_v5 = vcombine.low %v241_v0, %v245_v1  ;;  %v249_v6 = vld [vmem:[%s5292_s22 + $0x40] sm:$0xff]  ;;  %v4279_v8 = vcombine.high %v242_v2, %v246_v4  ;;  %v4278_v9 = vcombine.low %v242_v2, %v246_v4  ;;  %v250_v11 = vld [vmem:[%s5292_s22 + $0x48] sm:$0xff]  ;;  %s236_s10 = scalar_lea.vmem [#allocation8], %s4274_s30  ;;  %s5928_s11 = scalar_lea.hbm %s5975_s3, %s4799_s4 }
  0x76   : > { %v253_v7 = vld [vmem:[%s5292_s22 + $0x60] sm:$0xff]  ;;  %v254_v12 = vld [vmem:[%s5292_s22 + $0x68] sm:$0xff]  ;;  %v5320_v43 = vshrl.u32 %v755_v32, 7  ;;  %v799_v44 = vunpack.c.0.s8 %v798_v34  ;;  %s4159_s20 = sshll.u32 %s236_s10, 4  ;;  %s4145_s24 = scalar_lea.sflag [#allocation4], %s5289_s18  ;;  %s5930_s20 = int_to_ptr.vmem [resolvable:$true] %s4159_s20 }
  0x77   : > { %v4285_v10 = vcombine.high %v249_v6, %v253_v7  ;;  %v257_v13 = vld [vmem:[%s5292_s22 + $0x80] sm:$0xff]  ;;  %3413 = vmatprep.subr.bf16.mxu0 %v4277_v3  ;;  %v4287_v14 = vcombine.high %v250_v11, %v254_v12  ;;  %v258_v16 = vld [vmem:[%s5292_s22 + $0x88] sm:$0xff]  ;;  %3577 = vmatprep.subr.bf16.mxu1 %v4279_v8  ;;  %v4284_v18 = vcombine.low %v249_v6, %v253_v7  ;;  %s5011_s5 = scalar_lea.vmem %s5930_s20, 128  ;;  %p5996_p4 = scmp.ne.s32.totalorder %s5985_s26, 0 }
  0x78   : > { %v261_v15 = vld [vmem:[%s5292_s22 + $0xa0] sm:$0xff]  ;;  %v262_v17 = vld [vmem:[%s5292_s22 + $0xa8] sm:$0xff]  ;;  %3414 = vmatpush1.bf16.msra.mxu0 %v4276_v5  ;;  %3578 = vmatpush1.bf16.msra.mxu1 %v4278_v9  ;;  %v4286_v19 = vcombine.low %v250_v11, %v254_v12  ;;  %v5327_v53 = vsub.s32 %v799_v44, %v5320_v43  ;;  %p5012_p12 = scmp.ne.s32.totalorder %s5930_s20, %s5011_s5  ;;  %s5090_s6 = smov [#allocation8]  }
  0x79   : > { %3415 = vmatprep.subr.bf16.mxu0 %v4285_v10  ;;  %v4293_v20 = vcombine.high %v257_v13, %v261_v15  ;;  %3579 = vmatprep.subr.bf16.mxu1 %v4287_v14  ;;  %v4295_v21 = vcombine.high %v258_v16, %v262_v17  ;;  %v265_v22 = vld [vmem:[%s5292_s22 + $0xc0] sm:$0xff]  ;;  %v266_v24 = vld [vmem:[%s5292_s22 + $0xc8] sm:$0xff]  ;;  %v4292_v26 = vcombine.low %v257_v13, %v261_v15  ;;  %s5015_s7 = sshll.u32 %s5090_s6, 4  ;;  %s5016_s7 = int_to_ptr.vmem [resolvable:$false] %s5015_s7 }
  0x7a   : > { %v269_v23 = vld [vmem:[%s5292_s22 + $0xe0] sm:$0xff]  ;;  %v270_v25 = vld [vmem:[%s5292_s22 + $0xe8] sm:$0xff]  ;;  %v4294_v27 = vcombine.low %v258_v16, %v262_v17  ;;  %v5337_v63 = vrot.slane %v5331_v59, %v5327_v53  ;;  %p5013_p0 = pnand %p5012_p12, %p5996_p4  ;;  %s5017_s9 = scalar_lea.vmem %s5016_s7, 256 }
  0x7b   : > { %v4301_v28 = vcombine.high %v265_v22, %v269_v23  ;;  %v4303_v29 = vcombine.high %v266_v24, %v270_v25  ;;  %v273_v30 = vld [vmem:[%s5292_s22 + $0x100] sm:$0xff]  ;;  %v274_v35 = vld [vmem:[%s5292_s22 + $0x108] sm:$0xff]  ;;  %v4300_v37 = vcombine.low %v265_v22, %v269_v23  ;;  %v4302_v38 = vcombine.low %v266_v24, %v270_v25  ;;  %p5018_p13 = scmp.lt.s32.totalorder %s5930_s20, %s5016_s7  ;;  %p5019_p3 = scmp.lt.s32.totalorder %s5017_s9, %s5011_s5 }
  0x7c   : > { %3416 = vmatpush1.bf16.msra.mxu0 %v4284_v18  ;;  %3580 = vmatpush1.bf16.msra.mxu1 %v4286_v19  ;;  %v277_v31 = vld [vmem:[%s5292_s22 + $0x120] sm:$0xff]  ;;  %v278_v36 = vld [vmem:[%s5292_s22 + $0x128] sm:$0xff]  ;;  %v811_v3 = vcombine.high %v5337_v63, %v5337_v63  ;;  %p5014_p11 = pneg %p5013_p0 }
  0x7d   : > { %3417 = vmatprep.subr.bf16.mxu0 %v4293_v20  ;;  %3581 = vmatprep.subr.bf16.mxu1 %v4295_v21  ;;  %v4309_v39 = vcombine.high %v273_v30, %v277_v31  ;;  %v4311_v40 = vcombine.high %v274_v35, %v278_v36  ;;  %v281_v41 = vld [vmem:[%s5292_s22 + $0x140] sm:$0xff]  ;;  %v282_v45 = vld [vmem:[%s5292_s22 + $0x148] sm:$0xff]  ;;  %v4308_v47 = vcombine.low %v273_v30, %v277_v31  ;;  %p5020_p8 = por %p5019_p3, %p5018_p13 }
  0x7e   : > { %v285_v42 = vld [vmem:[%s5292_s22 + $0x160] sm:$0xff]  ;;  %v286_v46 = vld [vmem:[%s5292_s22 + $0x168] sm:$0xff]  ;;  %v4310_v48 = vcombine.low %v274_v35, %v278_v36  ;;  %v5346_v9 = vrot.slane %v811_v3, %v5327_v53 }
  0x7f   : > { %v4317_v49 = vcombine.high %v281_v41, %v285_v42  ;;  %v4319_v50 = vcombine.high %v282_v45, %v286_v46  ;;  %v289_v51 = vld [vmem:[%s5292_s22 + $0x180] sm:$0xff]  ;;  %v290_v54 = vld [vmem:[%s5292_s22 + $0x188] sm:$0xff]  ;;  %v4316_v56 = vcombine.low %v281_v41, %v285_v42  ;;  %v4318_v57 = vcombine.low %v282_v45, %v286_v46  ;;  %p5021_p1 = pnand %p5020_p8, %p5014_p11 }
  0x80   : > { %3418 = vmatpush1.bf16.msra.mxu0 %v4292_v26  ;;  %3582 = vmatpush1.bf16.msra.mxu1 %v4294_v27  ;;  %v293_v52 = vld [vmem:[%s5292_s22 + $0x1a0] sm:$0xff]  ;;  %v294_v55 = vld [vmem:[%s5292_s22 + $0x1a8] sm:$0xff] }
  0x81   : > { %3419 = vmatprep.subr.bf16.mxu0 %v4301_v28  ;;  %3583 = vmatprep.subr.bf16.mxu1 %v4303_v29  ;;  %v4325_v58 = vcombine.high %v289_v51, %v293_v52  ;;  %v4327_v60 = vcombine.high %v290_v54, %v294_v55  ;;  %v297_v61 = vld [vmem:[%s5292_s22 + $0x1c0] sm:$0xff]  ;;  %v298_v0 = vld [vmem:[%s5292_s22 + $0x1c8] sm:$0xff]  ;;  %v4324_v2 = vcombine.low %v289_v51, %v293_v52 }
  0x82   : > { %v301_v62 = vld [vmem:[%s5292_s22 + $0x1e0] sm:$0xff]  ;;  %v302_v1 = vld [vmem:[%s5292_s22 + $0x1e8] sm:$0xff]  ;;  %v4326_v4 = vcombine.low %v290_v54, %v294_v55  ;;  %3445 = vmatprep.mubr.bf16.mxu0 %v5346_v9  ;;  %3609 = vmatprep.mubr.bf16.mxu1 %v5346_v9 }
  0x83   : > { %v4333_v5 = vcombine.high %v297_v61, %v301_v62  ;;  %v4335_v6 = vcombine.high %v298_v0, %v302_v1  ;;  %v305_v7 = vld [vmem:[%s5292_s22 + $0x200] sm:$0xff]  ;;  %v306_v10 = vld [vmem:[%s5292_s22 + $0x208] sm:$0xff]  ;;  %v4332_v12 = vcombine.low %v297_v61, %v301_v62  ;;  %v4334_v13 = vcombine.low %v298_v0, %v302_v1 }
  0x84   : > { %3420 = vmatpush1.bf16.msra.mxu0 %v4300_v37  ;;  %3584 = vmatpush1.bf16.msra.mxu1 %v4302_v38  ;;  %v309_v8 = vld [vmem:[%s5292_s22 + $0x220] sm:$0xff]  ;;  %v310_v11 = vld [vmem:[%s5292_s22 + $0x228] sm:$0xff] }
  0x85   : > { %3421 = vmatprep.subr.bf16.mxu0 %v4309_v39  ;;  %3585 = vmatprep.subr.bf16.mxu1 %v4311_v40  ;;  %v4341_v14 = vcombine.high %v305_v7, %v309_v8  ;;  %v4343_v15 = vcombine.high %v306_v10, %v310_v11  ;;  %v313_v16 = vld [vmem:[%s5292_s22 + $0x240] sm:$0xff]  ;;  %v314_v18 = vld [vmem:[%s5292_s22 + $0x248] sm:$0xff]  ;;  %v4340_v20 = vcombine.low %v305_v7, %v309_v8 }
  0x86   : > { %v317_v17 = vld [vmem:[%s5292_s22 + $0x260] sm:$0xff]  ;;  %v318_v19 = vld [vmem:[%s5292_s22 + $0x268] sm:$0xff]  ;;  %v4342_v21 = vcombine.low %v306_v10, %v310_v11 }
  0x87   : > { %v4349_v22 = vcombine.high %v313_v16, %v317_v17  ;;  %v4351_v23 = vcombine.high %v314_v18, %v318_v19  ;;  %v321_v24 = vld [vmem:[%s5292_s22 + $0x280] sm:$0xff]  ;;  %v322_v26 = vld [vmem:[%s5292_s22 + $0x288] sm:$0xff]  ;;  %v4348_v28 = vcombine.low %v313_v16, %v317_v17  ;;  %v4350_v29 = vcombine.low %v314_v18, %v318_v19 }
  0x88   : > { %3422 = vmatpush1.bf16.msra.mxu0 %v4308_v47  ;;  %3586 = vmatpush1.bf16.msra.mxu1 %v4310_v48  ;;  %v325_v25 = vld [vmem:[%s5292_s22 + $0x2a0] sm:$0xff]  ;;  %v326_v27 = vld [vmem:[%s5292_s22 + $0x2a8] sm:$0xff] }
  0x89   : > { %3423 = vmatprep.subr.bf16.mxu0 %v4317_v49  ;;  %3587 = vmatprep.subr.bf16.mxu1 %v4319_v50  ;;  %v4357_v30 = vcombine.high %v321_v24, %v325_v25  ;;  %v4359_v31 = vcombine.high %v322_v26, %v326_v27  ;;  %v329_v32 = vld [vmem:[%s5292_s22 + $0x2c0] sm:$0xff]  ;;  %v330_v34 = vld [vmem:[%s5292_s22 + $0x2c8] sm:$0xff]  ;;  %v4356_v36 = vcombine.low %v321_v24, %v325_v25 }
  0x8a   : > { %v333_v33 = vld [vmem:[%s5292_s22 + $0x2e0] sm:$0xff]  ;;  %v334_v35 = vld [vmem:[%s5292_s22 + $0x2e8] sm:$0xff]  ;;  %v4358_v37 = vcombine.low %v322_v26, %v326_v27 }
  0x8b   : > { %v4365_v38 = vcombine.high %v329_v32, %v333_v33  ;;  %v4367_v39 = vcombine.high %v330_v34, %v334_v35  ;;  %v337_v40 = vld [vmem:[%s5292_s22 + $0x300] sm:$0xff]  ;;  %v338_v42 = vld [vmem:[%s5292_s22 + $0x308] sm:$0xff]  ;;  %v4364_v45 = vcombine.low %v329_v32, %v333_v33  ;;  %v4366_v46 = vcombine.low %v330_v34, %v334_v35 }
  0x8c   : > { %3424 = vmatpush1.bf16.msra.mxu0 %v4316_v56  ;;  %3588 = vmatpush1.bf16.msra.mxu1 %v4318_v57  ;;  %v341_v41 = vld [vmem:[%s5292_s22 + $0x320] sm:$0xff]  ;;  %v342_v44 = vld [vmem:[%s5292_s22 + $0x328] sm:$0xff]  ;;  %v5396_v32 = vcombine.high %v5346_v9, %v5346_v9 }
  0x8d   : > { %3425 = vmatprep.subr.bf16.mxu0 %v4325_v58  ;;  %3589 = vmatprep.subr.bf16.mxu1 %v4327_v60  ;;  %v4373_v47 = vcombine.high %v337_v40, %v341_v41  ;;  %v4375_v48 = vcombine.high %v338_v42, %v342_v44  ;;  %v345_v49 = vld [vmem:[%s5292_s22 + $0x340] sm:$0xff]  ;;  %v346_v51 = vld [vmem:[%s5292_s22 + $0x348] sm:$0xff]  ;;  %v4372_v54 = vcombine.low %v337_v40, %v341_v41 }
  0x8e   : > { %v349_v50 = vld [vmem:[%s5292_s22 + $0x360] sm:$0xff]  ;;  %v350_v52 = vld [vmem:[%s5292_s22 + $0x368] sm:$0xff]  ;;  %v4374_v55 = vcombine.low %v338_v42, %v342_v44 }
  0x8f   : > { %v4381_v56 = vcombine.high %v345_v49, %v349_v50  ;;  %v4383_v57 = vcombine.high %v346_v51, %v350_v52  ;;  %v353_v58 = vld [vmem:[%s5292_s22 + $0x380] sm:$0xff]  ;;  %v354_v61 = vld [vmem:[%s5292_s22 + $0x388] sm:$0xff]  ;;  %v4380_v0 = vcombine.low %v345_v49, %v349_v50  ;;  %v4382_v1 = vcombine.low %v346_v51, %v350_v52 }
  0x90   : > { %3426 = vmatpush1.bf16.msra.mxu0 %v4324_v2  ;;  %3590 = vmatpush1.bf16.msra.mxu1 %v4326_v4  ;;  %v357_v60 = vld [vmem:[%s5292_s22 + $0x3a0] sm:$0xff]  ;;  %v358_v62 = vld [vmem:[%s5292_s22 + $0x3a8] sm:$0xff] }
  0x91   : > { %3427 = vmatprep.subr.bf16.mxu0 %v4333_v5  ;;  %3591 = vmatprep.subr.bf16.mxu1 %v4335_v6  ;;  %v4389_v2 = vcombine.high %v353_v58, %v357_v60  ;;  %v4391_v3 = vcombine.high %v354_v61, %v358_v62  ;;  %v361_v4 = vld [vmem:[%s5292_s22 + $0x3c0] sm:$0xff]  ;;  %v362_v6 = vld [vmem:[%s5292_s22 + $0x3c8] sm:$0xff]  ;;  %v4388_v8 = vcombine.low %v353_v58, %v357_v60 }
  0x92   : > { %v365_v5 = vld [vmem:[%s5292_s22 + $0x3e0] sm:$0xff]  ;;  %v366_v7 = vld [vmem:[%s5292_s22 + $0x3e8] sm:$0xff]  ;;  %v4390_v10 = vcombine.low %v354_v61, %v358_v62 }
  0x93   : > { %v4397_v11 = vcombine.high %v361_v4, %v365_v5  ;;  %v374_v16 = vld [vmem:[%s5292_s22 + $0x428] sm:$0xff]  ;;  %v4396_v17 = vcombine.low %v361_v4, %v365_v5  ;;  %v4398_v18 = vcombine.low %v362_v6, %v366_v7 }
  0x94   : > { %3428 = vmatpush1.bf16.msra.mxu0 %v4332_v12  ;;  %3592 = vmatpush1.bf16.msra.mxu1 %v4334_v13  ;;  %v4399_v12 = vcombine.high %v362_v6, %v366_v7  ;;  %v369_v13 = vld [vmem:[%s5292_s22 + $0x400] sm:$0xff]  ;;  %v378_v24 = vld [vmem:[%s5292_s22 + $0x448] sm:$0xff] }
  0x95   : > { %3429 = vmatprep.subr.bf16.mxu0 %v4341_v14  ;;  %3593 = vmatprep.subr.bf16.mxu1 %v4343_v15  ;;  %v373_v14 = vld [vmem:[%s5292_s22 + $0x420] sm:$0xff]  ;;  %v370_v15 = vld [vmem:[%s5292_s22 + $0x408] sm:$0xff] }
  0x96   : > { %v4405_v19 = vcombine.high %v369_v13, %v373_v14  ;;  %v382_v25 = vld [vmem:[%s5292_s22 + $0x468] sm:$0xff]  ;;  %v4404_v26 = vcombine.low %v369_v13, %v373_v14  ;;  %v4406_v27 = vcombine.low %v370_v15, %v374_v16 }
  0x97   : > { %v390_v33 = vld [vmem:[%s5292_s22 + $0x4a8] sm:$0xff]  ;;  %v4414_v35 = vcombine.low %v378_v24, %v382_v25 }
  0x98   : > { %3430 = vmatpush1.bf16.msra.mxu0 %v4340_v20  ;;  %3594 = vmatpush1.bf16.msra.mxu1 %v4342_v21  ;;  %v4407_v20 = vcombine.high %v370_v15, %v374_v16  ;;  %v377_v21 = vld [vmem:[%s5292_s22 + $0x440] sm:$0xff]  ;;  %v394_v40 = vld [vmem:[%s5292_s22 + $0x4c8] sm:$0xff] }
  0x99   : > { %3431 = vmatprep.subr.bf16.mxu0 %v4349_v22  ;;  %3595 = vmatprep.subr.bf16.mxu1 %v4351_v23  ;;  %v381_v22 = vld [vmem:[%s5292_s22 + $0x460] sm:$0xff]  ;;  %v5388_v23 = vrot.slane %v5337_v63, %v5327_v53  ;;  %v386_v63 = vld [vmem:[%s5292_s22 + $0x488] sm:$0xff] }
  0x9a   : > { %v4412_v34 = vcombine.low %v377_v21, %v381_v22  ;;  %v398_v41 = vld [vmem:[%s5292_s22 + $0x4e8] sm:$0xff]  ;;  %v4422_v44 = vcombine.low %v386_v63, %v390_v33 }
  0x9b   : > { %v402_v49 = vld [vmem:[%s5292_s22 + $0x508] sm:$0xff]  ;;  %v4430_v52 = vcombine.low %v394_v40, %v398_v41 }
  0x9c   : > { %3432 = vmatpush1.bf16.msra.mxu0 %v4348_v28  ;;  %3596 = vmatpush1.bf16.msra.mxu1 %v4350_v29  ;;  %v4413_v28 = vcombine.high %v377_v21, %v381_v22  ;;  %v4415_v29 = vcombine.high %v378_v24, %v382_v25  ;;  %v406_v50 = vld [vmem:[%s5292_s22 + $0x528] sm:$0xff] }
  0x9d   : > { %3433 = vmatprep.subr.bf16.mxu0 %v4357_v30  ;;  %3597 = vmatprep.subr.bf16.mxu1 %v4359_v31  ;;  %v385_v30 = vld [vmem:[%s5292_s22 + $0x480] sm:$0xff]  ;;  %v410_v58 = vld [vmem:[%s5292_s22 + $0x548] sm:$0xff]  ;;  %v4438_v62 = vcombine.low %v402_v49, %v406_v50 }
  0x9e   : > { %v389_v31 = vld [vmem:[%s5292_s22 + $0x4a0] sm:$0xff]  ;;  %v414_v60 = vld [vmem:[%s5292_s22 + $0x568] sm:$0xff] }
  0x9f   : > { %v4420_v42 = vcombine.low %v385_v30, %v389_v31  ;;  %v418_v4 = vld [vmem:[%s5292_s22 + $0x588] sm:$0xff]  ;;  %v4446_v7 = vcombine.low %v410_v58, %v414_v60 }
  0xa0   : > { %3434 = vmatpush1.bf16.msra.mxu0 %v4356_v36  ;;  %3598 = vmatpush1.bf16.msra.mxu1 %v4358_v37  ;;  %v4421_v36 = vcombine.high %v385_v30, %v389_v31  ;;  %v4423_v37 = vcombine.high %v386_v63, %v390_v33  ;;  %v422_v5 = vld [vmem:[%s5292_s22 + $0x5a8] sm:$0xff] }
  0xa1   : > { %3435 = vmatprep.subr.bf16.mxu0 %v4365_v38  ;;  %3599 = vmatprep.subr.bf16.mxu1 %v4367_v39  ;;  %v393_v38 = vld [vmem:[%s5292_s22 + $0x4c0] sm:$0xff]  ;;  %v426_v13 = vld [vmem:[%s5292_s22 + $0x5c8] sm:$0xff]  ;;  %v4454_v16 = vcombine.low %v418_v4, %v422_v5 }
  0xa2   : > { %v397_v39 = vld [vmem:[%s5292_s22 + $0x4e0] sm:$0xff]  ;;  %v430_v14 = vld [vmem:[%s5292_s22 + $0x5e8] sm:$0xff] }
  0xa3   : > { %v4428_v51 = vcombine.low %v393_v38, %v397_v39  ;;  %v434_v21 = vld [vmem:[%s5292_s22 + $0x608] sm:$0xff]  ;;  %v4462_v25 = vcombine.low %v426_v13, %v430_v14 }
  0xa4   : > { %3436 = vmatpush1.bf16.msra.mxu0 %v4364_v45  ;;  %3600 = vmatpush1.bf16.msra.mxu1 %v4366_v46  ;;  %v4429_v45 = vcombine.high %v393_v38, %v397_v39  ;;  %v4431_v46 = vcombine.high %v394_v40, %v398_v41  ;;  %v438_v22 = vld [vmem:[%s5292_s22 + $0x628] sm:$0xff] }
  0xa5   : > { %3437 = vmatprep.subr.bf16.mxu0 %v4373_v47  ;;  %3601 = vmatprep.subr.bf16.mxu1 %v4375_v48  ;;  %v401_v47 = vld [vmem:[%s5292_s22 + $0x500] sm:$0xff]  ;;  %v442_v30 = vld [vmem:[%s5292_s22 + $0x648] sm:$0xff]  ;;  %v4470_v33 = vcombine.low %v434_v21, %v438_v22 }
  0xa6   : > { %v405_v48 = vld [vmem:[%s5292_s22 + $0x520] sm:$0xff]  ;;  %v446_v31 = vld [vmem:[%s5292_s22 + $0x668] sm:$0xff] }
  0xa7   : > { %v4436_v61 = vcombine.low %v401_v47, %v405_v48  ;;  %v450_v38 = vld [vmem:[%s5292_s22 + $0x688] sm:$0xff]  ;;  %v4478_v41 = vcombine.low %v442_v30, %v446_v31 }
  0xa8   : > { %3438 = vmatpush1.bf16.msra.mxu0 %v4372_v54  ;;  %3602 = vmatpush1.bf16.msra.mxu1 %v4374_v55  ;;  %v4437_v54 = vcombine.high %v401_v47, %v405_v48  ;;  %v4439_v55 = vcombine.high %v402_v49, %v406_v50  ;;  %v454_v39 = vld [vmem:[%s5292_s22 + $0x6a8] sm:$0xff] }
  0xa9   : > { %3439 = vmatprep.subr.bf16.mxu0 %v4381_v56  ;;  %3603 = vmatprep.subr.bf16.mxu1 %v4383_v57  ;;  %v409_v56 = vld [vmem:[%s5292_s22 + $0x540] sm:$0xff]  ;;  %v458_v47 = vld [vmem:[%s5292_s22 + $0x6c8] sm:$0xff]  ;;  %v4486_v50 = vcombine.low %v450_v38, %v454_v39 }
  0xaa   : > { %v413_v57 = vld [vmem:[%s5292_s22 + $0x560] sm:$0xff]  ;;  %v462_v48 = vld [vmem:[%s5292_s22 + $0x6e8] sm:$0xff] }
  0xab   : > { %v4444_v6 = vcombine.low %v409_v56, %v413_v57 }
  0xac   : > { %3440 = vmatpush1.bf16.msra.mxu0 %v4380_v0  ;;  %3604 = vmatpush1.bf16.msra.mxu1 %v4382_v1  ;;  %v4445_v0 = vcombine.high %v409_v56, %v413_v57  ;;  %v4447_v1 = vcombine.high %v410_v58, %v414_v60  ;;  %v466_v56 = vld [vmem:[%s5292_s22 + $0x708] sm:$0xff]  ;;  %v4494_v60 = vcombine.low %v458_v47, %v462_v48 }
  0xad   : > { %3441 = vmatprep.subr.bf16.mxu0 %v4389_v2  ;;  %3605 = vmatprep.subr.bf16.mxu1 %v4391_v3  ;;  %v417_v2 = vld [vmem:[%s5292_s22 + $0x580] sm:$0xff]  ;;  %v470_v57 = vld [vmem:[%s5292_s22 + $0x728] sm:$0xff] }
  0xae   : > { %v421_v3 = vld [vmem:[%s5292_s22 + $0x5a0] sm:$0xff] }
  0xaf   : > { %v4452_v15 = vcombine.low %v417_v2, %v421_v3 }
  0xb0   : > { %3442 = vmatpush1.bf16.msra.mxu0 %v4388_v8  ;;  %3606 = vmatpush1.bf16.msra.mxu1 %v4390_v10  ;;  %v4453_v8 = vcombine.high %v417_v2, %v421_v3  ;;  %v4455_v10 = vcombine.high %v418_v4, %v422_v5  ;;  %v474_v2 = vld [vmem:[%s5292_s22 + $0x748] sm:$0xff]  ;;  %v4502_v5 = vcombine.low %v466_v56, %v470_v57 }
  0xb1   : > { %3443 = vmatprep.subr.bf16.mxu0 %v4397_v11  ;;  %3607 = vmatprep.subr.bf16.mxu1 %v4399_v12  ;;  %v425_v11 = vld [vmem:[%s5292_s22 + $0x5c0] sm:$0xff]  ;;  %v478_v3 = vld [vmem:[%s5292_s22 + $0x768] sm:$0xff] }
  0xb2   : > { %v429_v12 = vld [vmem:[%s5292_s22 + $0x5e0] sm:$0xff] }
  0xb3   : > { %v4460_v24 = vcombine.low %v425_v11, %v429_v12 }
  0xb4   : > { %3444 = vmatpush1.bf16.msra.mxu0 %v4396_v17  ;;  %3608 = vmatpush1.bf16.msra.mxu1 %v4398_v18  ;;  %v4461_v17 = vcombine.high %v425_v11, %v429_v12  ;;  %v4463_v18 = vcombine.high %v426_v13, %v430_v14  ;;  %v482_v11 = vld [vmem:[%s5292_s22 + $0x788] sm:$0xff]  ;;  %v4510_v14 = vcombine.low %v474_v2, %v478_v3 }
  0xb5   : > { %3454 = vmatprep.subr.bf16.mxu0 %v4405_v19  ;;  %3618 = vmatprep.subr.bf16.mxu1 %v4407_v20  ;;  %v433_v19 = vld [vmem:[%s5292_s22 + $0x600] sm:$0xff]  ;;  %v486_v12 = vld [vmem:[%s5292_s22 + $0x7a8] sm:$0xff] }
  0xb6   : > { %v437_v20 = vld [vmem:[%s5292_s22 + $0x620] sm:$0xff] }
  0xb7   : > { %3446 = vmatmul.mubr.bf16.vlgmr.msra.gmra.mrb[0].mxu0 %v5388_v23  ;;  %3610 = vmatmul.mubr.bf16.vlgmr.msra.gmra.mrb[0].mxu1 %v5388_v23  ;;  %v4468_v63 = vcombine.low %v433_v19, %v437_v20 }
  0xb8   : > { %3455 = vmatpush1.bf16.msra.mxu0 %v4404_v26  ;;  %3619 = vmatpush1.bf16.msra.mxu1 %v4406_v27  ;;  %v4469_v26 = vcombine.high %v433_v19, %v437_v20  ;;  %v4471_v27 = vcombine.high %v434_v21, %v438_v22  ;;  %v796_v19 = vcombine.high %v5331_v59, %v5331_v59  ;;  %v490_v20 = vld [vmem:[%s5292_s22 + $0x7c8] sm:$0xff] }
  0xb9   : > { %3456 = vmatprep.subr.bf16.mxu0 %v4413_v28  ;;  %3620 = vmatprep.subr.bf16.mxu1 %v4415_v29  ;;  %v441_v28 = vld [vmem:[%s5292_s22 + $0x640] sm:$0xff]  ;;  %v494_v21 = vld [vmem:[%s5292_s22 + $0x7e8] sm:$0xff] }
  0xba   : > { %3486 = vmatprep.mubr.bf16.mxu0 %v5396_v32  ;;  %3650 = vmatprep.mubr.bf16.mxu1 %v5396_v32  ;;  %v445_v29 = vld [vmem:[%s5292_s22 + $0x660] sm:$0xff]  ;;  %v498_v59 = vld [vmem:[%s5292_s22 + $0x808] sm:$0xff] }
  0xbb   : > { %v4476_v40 = vcombine.low %v441_v28, %v445_v29 }
  0xbc   : > { %3457 = vmatpush1.bf16.msra.mxu0 %v4412_v34  ;;  %3621 = vmatpush1.bf16.msra.mxu1 %v4414_v35  ;;  %v4477_v34 = vcombine.high %v441_v28, %v445_v29  ;;  %v4479_v35 = vcombine.high %v442_v30, %v446_v31  ;;  %v501_v28 = vld [vmem:[%s5292_s22 + $0x820] sm:$0xff]  ;;  %v5461_v29 = vrot.slane %v796_v19, %v5327_v53  ;;  %v502_v30 = vld [vmem:[%s5292_s22 + $0x828] sm:$0xff] }
  0xbd   : > { %3458 = vmatprep.subr.bf16.mxu0 %v4421_v36  ;;  %3622 = vmatprep.subr.bf16.mxu1 %v4423_v37  ;;  %v449_v36 = vld [vmem:[%s5292_s22 + $0x680] sm:$0xff] }
  0xbe   : > { %v453_v37 = vld [vmem:[%s5292_s22 + $0x6a0] sm:$0xff] }
  0xbf   : > { %v4484_v49 = vcombine.low %v449_v36, %v453_v37  ;;  %v545_v19 = vld [vmem:[%s5292_s22 + $0x980] sm:$0xff] }
  0xc0   : > { %3459 = vmatpush1.bf16.msra.mxu0 %v4420_v42  ;;  %3623 = vmatpush1.bf16.msra.mxu1 %v4422_v44  ;;  %v4485_v42 = vcombine.high %v449_v36, %v453_v37  ;;  %v4487_v44 = vcombine.high %v450_v38, %v454_v39  ;;  %v509_v36 = vld [vmem:[%s5292_s22 + $0x860] sm:$0xff]  ;;  %v812_v37 = vcombine.high %v5461_v29, %v5461_v29  ;;  %v506_v39 = vld [vmem:[%s5292_s22 + $0x848] sm:$0xff] }
  0xc1   : > { %3460 = vmatprep.subr.bf16.mxu0 %v4429_v45  ;;  %3624 = vmatprep.subr.bf16.mxu1 %v4431_v46  ;;  %v457_v45 = vld [vmem:[%s5292_s22 + $0x6c0] sm:$0xff]  ;;  %v5471_v38 = vcombine.high %v5388_v23, %v5388_v23 }
  0xc2   : > { %v461_v46 = vld [vmem:[%s5292_s22 + $0x6e0] sm:$0xff] }
  0xc3   : > { %v4492_v58 = vcombine.low %v457_v45, %v461_v46 }
  0xc4   : > { %3461 = vmatpush1.bf16.msra.mxu0 %v4428_v51  ;;  %3625 = vmatpush1.bf16.msra.mxu1 %v4430_v52  ;;  %v4493_v51 = vcombine.high %v457_v45, %v461_v46  ;;  %v4495_v52 = vcombine.high %v458_v47, %v462_v48  ;;  %v513_v46 = vld [vmem:[%s5292_s22 + $0x880] sm:$0xff]  ;;  %v5478_v48 = vrot.slane %v812_v37, %v5327_v53 }
  0xc5   : > { %3462 = vmatprep.subr.bf16.mxu0 %v4437_v54  ;;  %3626 = vmatprep.subr.bf16.mxu1 %v4439_v55  ;;  %v465_v54 = vld [vmem:[%s5292_s22 + $0x700] sm:$0xff] }
  0xc6   : > { %v469_v55 = vld [vmem:[%s5292_s22 + $0x720] sm:$0xff] }
  0xc7   : > { %v4500_v4 = vcombine.low %v465_v54, %v469_v55  ;;  %v517_v47 = vld [vmem:[%s5292_s22 + $0x8a0] sm:$0xff] }
  0xc8   : > { %3463 = vmatpush1.bf16.msra.mxu0 %v4436_v61  ;;  %3627 = vmatpush1.bf16.msra.mxu1 %v4438_v62  ;;  %v4501_v61 = vcombine.high %v465_v54, %v469_v55  ;;  %v4503_v62 = vcombine.high %v466_v56, %v470_v57  ;;  %v4549_v54 = vcombine.high %v513_v46, %v517_v47  ;;  %v521_v56 = vld [vmem:[%s5292_s22 + $0x8c0] sm:$0xff] }
  0xc9   : > { %3464 = vmatprep.subr.bf16.mxu0 %v4445_v0  ;;  %3628 = vmatprep.subr.bf16.mxu1 %v4447_v1  ;;  %v473_v0 = vld [vmem:[%s5292_s22 + $0x740] sm:$0xff] }
  0xca   : > { %v477_v1 = vld [vmem:[%s5292_s22 + $0x760] sm:$0xff] }
  0xcb   : > { %v4508_v13 = vcombine.low %v473_v0, %v477_v1  ;;  %v525_v57 = vld [vmem:[%s5292_s22 + $0x8e0] sm:$0xff] }
  0xcc   : > { %3465 = vmatpush1.bf16.msra.mxu0 %v4444_v6  ;;  %3629 = vmatpush1.bf16.msra.mxu1 %v4446_v7  ;;  %v4509_v6 = vcombine.high %v473_v0, %v477_v1  ;;  %v4511_v7 = vcombine.high %v474_v2, %v478_v3  ;;  %v4557_v0 = vcombine.high %v521_v56, %v525_v57  ;;  %v529_v2 = vld [vmem:[%s5292_s22 + $0x900] sm:$0xff] }
  0xcd   : > { %3466 = vmatprep.subr.bf16.mxu0 %v4453_v8  ;;  %3630 = vmatprep.subr.bf16.mxu1 %v4455_v10  ;;  %v481_v8 = vld [vmem:[%s5292_s22 + $0x780] sm:$0xff] }
  0xce   : > { %v485_v10 = vld [vmem:[%s5292_s22 + $0x7a0] sm:$0xff] }
  0xcf   : > { %v4516_v22 = vcombine.low %v481_v8, %v485_v10  ;;  %v533_v3 = vld [vmem:[%s5292_s22 + $0x920] sm:$0xff] }
  0xd0   : > { %3467 = vmatpush1.bf16.msra.mxu0 %v4452_v15  ;;  %3631 = vmatpush1.bf16.msra.mxu1 %v4454_v16  ;;  %v4517_v15 = vcombine.high %v481_v8, %v485_v10  ;;  %v4519_v16 = vcombine.high %v482_v11, %v486_v12  ;;  %v4565_v8 = vcombine.high %v529_v2, %v533_v3  ;;  %v565_v37 = vld [vmem:[%s5292_s22 + $0xa20] sm:$0xff] }
  0xd1   : > { %3468 = vmatprep.subr.bf16.mxu0 %v4461_v17  ;;  %3632 = vmatprep.subr.bf16.mxu1 %v4463_v18  ;;  %v489_v17 = vld [vmem:[%s5292_s22 + $0x7c0] sm:$0xff] }
  0xd2   : > { %v493_v18 = vld [vmem:[%s5292_s22 + $0x7e0] sm:$0xff] }
  0xd3   : > { %v4524_v31 = vcombine.low %v489_v17, %v493_v18 }
  0xd4   : > { %3469 = vmatpush1.bf16.msra.mxu0 %v4460_v24  ;;  %3633 = vmatpush1.bf16.msra.mxu1 %v4462_v25  ;;  %v4518_v24 = vcombine.low %v482_v11, %v486_v12  ;;  %v4525_v25 = vcombine.high %v489_v17, %v493_v18  ;;  %v537_v11 = vld [vmem:[%s5292_s22 + $0x940] sm:$0xff] }
  0xd5   : > { %3470 = vmatprep.subr.bf16.mxu0 %v4469_v26  ;;  %3634 = vmatprep.subr.bf16.mxu1 %v4471_v27  ;;  %v4527_v26 = vcombine.high %v490_v20, %v494_v21  ;;  %v497_v27 = vld [vmem:[%s5292_s22 + $0x800] sm:$0xff] }
  0xd6   : > { %v541_v12 = vld [vmem:[%s5292_s22 + $0x960] sm:$0xff] }
  0xd7   : > { %v4573_v17 = vcombine.high %v537_v11, %v541_v12 }
  0xd8   : > { %3471 = vmatpush1.bf16.msra.mxu0 %v4468_v63  ;;  %3635 = vmatpush1.bf16.msra.mxu1 %v4470_v33  ;;  %v4526_v63 = vcombine.low %v490_v20, %v494_v21  ;;  %v4533_v33 = vcombine.high %v497_v27, %v501_v28  ;;  %v549_v20 = vld [vmem:[%s5292_s22 + $0x9a0] sm:$0xff]  ;;  %v546_v21 = vld [vmem:[%s5292_s22 + $0x988] sm:$0xff] }
  0xd9   : > { %3472 = vmatprep.subr.bf16.mxu0 %v4477_v34  ;;  %3636 = vmatprep.subr.bf16.mxu1 %v4479_v35  ;;  %v4535_v34 = vcombine.high %v498_v59, %v502_v30  ;;  %v505_v35 = vld [vmem:[%s5292_s22 + $0x840] sm:$0xff] }
  0xdc   : > { %3473 = vmatpush1.bf16.msra.mxu0 %v4476_v40  ;;  %3637 = vmatpush1.bf16.msra.mxu1 %v4478_v41  ;;  %v510_v40 = vld [vmem:[%s5292_s22 + $0x868] sm:$0xff]  ;;  %v4532_v41 = vcombine.low %v497_v27, %v501_v28  ;;  %v553_v28 = vld [vmem:[%s5292_s22 + $0x9c0] sm:$0xff] }
  0xdd   : > { %3474 = vmatprep.subr.bf16.mxu0 %v4485_v42  ;;  %3638 = vmatprep.subr.bf16.mxu1 %v4487_v44  ;;  %v4534_v42 = vcombine.low %v498_v59, %v502_v30  ;;  %v4541_v44 = vcombine.high %v505_v35, %v509_v36  ;;  %v4543_v45 = vcombine.high %v506_v39, %v510_v40  ;;  %v557_v59 = vld [vmem:[%s5292_s22 + $0x9e0] sm:$0xff]  ;;  %v554_v30 = vld [vmem:[%s5292_s22 + $0x9c8] sm:$0xff] }
  0xe0   : > { %3475 = vmatpush1.bf16.msra.mxu0 %v4484_v49  ;;  %3639 = vmatpush1.bf16.msra.mxu1 %v4486_v50  ;;  %v514_v49 = vld [vmem:[%s5292_s22 + $0x888] sm:$0xff] }
  0xe1   : > { %3476 = vmatprep.subr.bf16.mxu0 %v4493_v51  ;;  %3640 = vmatprep.subr.bf16.mxu1 %v4495_v52  ;;  %v518_v50 = vld [vmem:[%s5292_s22 + $0x8a8] sm:$0xff]  ;;  %v4540_v51 = vcombine.low %v505_v35, %v509_v36  ;;  %v4542_v52 = vcombine.low %v506_v39, %v510_v40  ;;  %v561_v36 = vld [vmem:[%s5292_s22 + $0xa00] sm:$0xff] }
  0xe2   : > { %v4551_v55 = vcombine.high %v514_v49, %v518_v50  ;;  %v562_v39 = vld [vmem:[%s5292_s22 + $0xa08] sm:$0xff] }
  0xe3   : > { %v566_v40 = vld [vmem:[%s5292_s22 + $0xa28] sm:$0xff] }
  0xe4   : > { %3477 = vmatpush1.bf16.msra.mxu0 %v4492_v58  ;;  %3641 = vmatpush1.bf16.msra.mxu1 %v4494_v60  ;;  %v522_v58 = vld [vmem:[%s5292_s22 + $0x8c8] sm:$0xff] }
  0xe5   : > { %3478 = vmatprep.subr.bf16.mxu0 %v4501_v61  ;;  %3642 = vmatprep.subr.bf16.mxu1 %v4503_v62  ;;  %v526_v60 = vld [vmem:[%s5292_s22 + $0x8e8] sm:$0xff]  ;;  %v4548_v61 = vcombine.low %v513_v46, %v517_v47  ;;  %v4550_v62 = vcombine.low %v514_v49, %v518_v50  ;;  %v569_v46 = vld [vmem:[%s5292_s22 + $0xa40] sm:$0xff] }
  0xe6   : > { %v4559_v1 = vcombine.high %v522_v58, %v526_v60  ;;  %v573_v47 = vld [vmem:[%s5292_s22 + $0xa60] sm:$0xff]  ;;  %v570_v49 = vld [vmem:[%s5292_s22 + $0xa48] sm:$0xff] }
  0xe7   : > { %v574_v50 = vld [vmem:[%s5292_s22 + $0xa68] sm:$0xff] }
  0xe8   : > { %3479 = vmatpush1.bf16.msra.mxu0 %v4500_v4  ;;  %3643 = vmatpush1.bf16.msra.mxu1 %v4502_v5  ;;  %v530_v4 = vld [vmem:[%s5292_s22 + $0x908] sm:$0xff] }
  0xe9   : > { %3480 = vmatprep.subr.bf16.mxu0 %v4509_v6  ;;  %3644 = vmatprep.subr.bf16.mxu1 %v4511_v7  ;;  %v534_v5 = vld [vmem:[%s5292_s22 + $0x928] sm:$0xff]  ;;  %v4556_v6 = vcombine.low %v521_v56, %v525_v57  ;;  %v4558_v7 = vcombine.low %v522_v58, %v526_v60  ;;  %v577_v56 = vld [vmem:[%s5292_s22 + $0xa80] sm:$0xff] }
  0xea   : > { %v4567_v10 = vcombine.high %v530_v4, %v534_v5  ;;  %v581_v57 = vld [vmem:[%s5292_s22 + $0xaa0] sm:$0xff]  ;;  %v578_v58 = vld [vmem:[%s5292_s22 + $0xa88] sm:$0xff] }
  0xeb   : > { %v582_v60 = vld [vmem:[%s5292_s22 + $0xaa8] sm:$0xff] }
  0xec   : > { %3481 = vmatpush1.bf16.msra.mxu0 %v4508_v13  ;;  %3645 = vmatpush1.bf16.msra.mxu1 %v4510_v14  ;;  %v538_v13 = vld [vmem:[%s5292_s22 + $0x948] sm:$0xff] }
  0xed   : > { %3482 = vmatprep.subr.bf16.mxu0 %v4517_v15  ;;  %3646 = vmatprep.subr.bf16.mxu1 %v4519_v16  ;;  %v542_v14 = vld [vmem:[%s5292_s22 + $0x968] sm:$0xff]  ;;  %v4564_v15 = vcombine.low %v529_v2, %v533_v3  ;;  %v4566_v16 = vcombine.low %v530_v4, %v534_v5  ;;  %v585_v2 = vld [vmem:[%s5292_s22 + $0xac0] sm:$0xff] }
  0xee   : > { %v4575_v18 = vcombine.high %v538_v13, %v542_v14  ;;  %v589_v3 = vld [vmem:[%s5292_s22 + $0xae0] sm:$0xff]  ;;  %v586_v4 = vld [vmem:[%s5292_s22 + $0xac8] sm:$0xff] }
  0xef   : > { %v590_v5 = vld [vmem:[%s5292_s22 + $0xae8] sm:$0xff] }
  0xf0   : > { %3483 = vmatpush1.bf16.msra.mxu0 %v4516_v22  ;;  %3647 = vmatpush1.bf16.msra.mxu1 %v4518_v24  ;;  %v550_v22 = vld [vmem:[%s5292_s22 + $0x9a8] sm:$0xff]  ;;  %v4572_v24 = vcombine.low %v537_v11, %v541_v12  ;;  %v593_v11 = vld [vmem:[%s5292_s22 + $0xb00] sm:$0xff] }
  0xf1   : > { %3484 = vmatprep.subr.bf16.mxu0 %v4525_v25  ;;  %3648 = vmatprep.subr.bf16.mxu1 %v4527_v26  ;;  %v4574_v25 = vcombine.low %v538_v13, %v542_v14  ;;  %v4581_v26 = vcombine.high %v545_v19, %v549_v20  ;;  %v4583_v27 = vcombine.high %v546_v21, %v550_v22  ;;  %v597_v12 = vld [vmem:[%s5292_s22 + $0xb20] sm:$0xff]  ;;  %v594_v13 = vld [vmem:[%s5292_s22 + $0xb08] sm:$0xff] }
  0xf2   : > { %v598_v14 = vld [vmem:[%s5292_s22 + $0xb28] sm:$0xff] }
  0xf4   : > { %3485 = vmatpush1.bf16.msra.mxu0 %v4524_v31  ;;  %3649 = vmatpush1.bf16.msra.mxu1 %v4526_v63  ;;  %v558_v31 = vld [vmem:[%s5292_s22 + $0x9e8] sm:$0xff]  ;;  %v4580_v63 = vcombine.low %v545_v19, %v549_v20  ;;  %v601_v19 = vld [vmem:[%s5292_s22 + $0xb40] sm:$0xff] }
  0xf5   : > { %3495 = vmatprep.subr.bf16.mxu0 %v4533_v33  ;;  %3659 = vmatprep.subr.bf16.mxu1 %v4535_v34  ;;  %v4582_v33 = vcombine.low %v546_v21, %v550_v22  ;;  %v4589_v34 = vcombine.high %v553_v28, %v557_v59  ;;  %v4591_v35 = vcombine.high %v554_v30, %v558_v31  ;;  %v605_v20 = vld [vmem:[%s5292_s22 + $0xb60] sm:$0xff]  ;;  %v602_v21 = vld [vmem:[%s5292_s22 + $0xb48] sm:$0xff] }
  0xf6   : > { %v606_v22 = vld [vmem:[%s5292_s22 + $0xb68] sm:$0xff] }
  0xf7   : > { %3487 = vmatmul.mubr.bf16.vlgmr.msra.gmra.mrb[0].mxu0 %v5471_v38  ;;  %3651 = vmatmul.mubr.bf16.vlgmr.msra.gmra.mrb[0].mxu1 %v5471_v38 }
  0xf8   : > { %3496 = vmatpush1.bf16.msra.mxu0 %v4532_v41  ;;  %3660 = vmatpush1.bf16.msra.mxu1 %v4534_v42  ;;  %v4588_v41 = vcombine.low %v553_v28, %v557_v59  ;;  %v4590_v42 = vcombine.low %v554_v30, %v558_v31  ;;  %v609_v28 = vld [vmem:[%s5292_s22 + $0xb80] sm:$0xff]  ;;  %v610_v30 = vld [vmem:[%s5292_s22 + $0xb88] sm:$0xff] }
  0xf9   : > { %3497 = vmatprep.subr.bf16.mxu0 %v4541_v44  ;;  %3661 = vmatprep.subr.bf16.mxu1 %v4543_v45  ;;  %v4597_v44 = vcombine.high %v561_v36, %v565_v37  ;;  %v4599_v45 = vcombine.high %v562_v39, %v566_v40  ;;  %v613_v59 = vld [vmem:[%s5292_s22 + $0xba0] sm:$0xff]  ;;  %v614_v31 = vld [vmem:[%s5292_s22 + $0xba8] sm:$0xff] }
  0xfa   : > { %3527 = vmatprep.mubr.bf16.mxu0 %v5478_v48  ;;  %3691 = vmatprep.mubr.bf16.mxu1 %v5478_v48 }
  0xfc   : > { %3498 = vmatpush1.bf16.msra.mxu0 %v4540_v51  ;;  %3662 = vmatpush1.bf16.msra.mxu1 %v4542_v52  ;;  %v4596_v51 = vcombine.low %v561_v36, %v565_v37  ;;  %v4598_v52 = vcombine.low %v562_v39, %v566_v40  ;;  %v617_v36 = vld [vmem:[%s5292_s22 + $0xbc0] sm:$0xff]  ;;  %v618_v39 = vld [vmem:[%s5292_s22 + $0xbc8] sm:$0xff] }
  0xfd   : > { %3499 = vmatprep.subr.bf16.mxu0 %v4549_v54  ;;  %3663 = vmatprep.subr.bf16.mxu1 %v4551_v55  ;;  %v4605_v54 = vcombine.high %v569_v46, %v573_v47  ;;  %v4607_v55 = vcombine.high %v570_v49, %v574_v50  ;;  %v621_v37 = vld [vmem:[%s5292_s22 + $0xbe0] sm:$0xff]  ;;  %v622_v40 = vld [vmem:[%s5292_s22 + $0xbe8] sm:$0xff] }
 0x100   : > { %3500 = vmatpush1.bf16.msra.mxu0 %v4548_v61  ;;  %3664 = vmatpush1.bf16.msra.mxu1 %v4550_v62  ;;  %v4604_v61 = vcombine.low %v569_v46, %v573_v47  ;;  %v4606_v62 = vcombine.low %v570_v49, %v574_v50  ;;  %v625_v46 = vld [vmem:[%s5292_s22 + $0xc00] sm:$0xff]  ;;  %v626_v49 = vld [vmem:[%s5292_s22 + $0xc08] sm:$0xff] }
 0x101   : > { %3501 = vmatprep.subr.bf16.mxu0 %v4557_v0  ;;  %3665 = vmatprep.subr.bf16.mxu1 %v4559_v1  ;;  %v4613_v0 = vcombine.high %v577_v56, %v581_v57  ;;  %v4615_v1 = vcombine.high %v578_v58, %v582_v60  ;;  %v629_v47 = vld [vmem:[%s5292_s22 + $0xc20] sm:$0xff]  ;;  %v630_v50 = vld [vmem:[%s5292_s22 + $0xc28] sm:$0xff] }
 0x104   : > { %3502 = vmatpush1.bf16.msra.mxu0 %v4556_v6  ;;  %3666 = vmatpush1.bf16.msra.mxu1 %v4558_v7  ;;  %v4612_v6 = vcombine.low %v577_v56, %v581_v57  ;;  %v4614_v7 = vcombine.low %v578_v58, %v582_v60  ;;  %v633_v56 = vld [vmem:[%s5292_s22 + $0xc40] sm:$0xff]  ;;  %v5546_v58 = vrot.slane %v5461_v29, %v5327_v53  ;;  %v634_v60 = vld [vmem:[%s5292_s22 + $0xc48] sm:$0xff] }
 0x105   : > { %3503 = vmatprep.subr.bf16.mxu0 %v4565_v8  ;;  %3667 = vmatprep.subr.bf16.mxu1 %v4567_v10  ;;  %v4621_v8 = vcombine.high %v585_v2, %v589_v3  ;;  %v4623_v10 = vcombine.high %v586_v4, %v590_v5  ;;  %v637_v57 = vld [vmem:[%s5292_s22 + $0xc60] sm:$0xff]  ;;  %v642_v29 = vld [vmem:[%s5292_s22 + $0xc88] sm:$0xff] }
 0x108   : > { %3504 = vmatpush1.bf16.msra.mxu0 %v4564_v15  ;;  %3668 = vmatpush1.bf16.msra.mxu1 %v4566_v16  ;;  %v4620_v15 = vcombine.low %v585_v2, %v589_v3  ;;  %v4622_v16 = vcombine.low %v586_v4, %v590_v5  ;;  %v641_v3 = vld [vmem:[%s5292_s22 + $0xc80] sm:$0xff]  ;;  %v5554_v5 = vcombine.high %v5478_v48, %v5478_v48 }
 0x109   : > { %3505 = vmatprep.subr.bf16.mxu0 %v4573_v17  ;;  %3669 = vmatprep.subr.bf16.mxu1 %v4575_v18  ;;  %v4629_v17 = vcombine.high %v593_v11, %v597_v12  ;;  %v4631_v18 = vcombine.high %v594_v13, %v598_v14  ;;  %v645_v4 = vld [vmem:[%s5292_s22 + $0xca0] sm:$0xff] }
 0x10c   : > { %3506 = vmatpush1.bf16.msra.mxu0 %v4572_v24  ;;  %3670 = vmatpush1.bf16.msra.mxu1 %v4574_v25  ;;  %v4628_v24 = vcombine.low %v593_v11, %v597_v12  ;;  %v4630_v25 = vcombine.low %v594_v13, %v598_v14  ;;  %v649_v12 = vld [vmem:[%s5292_s22 + $0xcc0] sm:$0xff]  ;;  %v650_v14 = vld [vmem:[%s5292_s22 + $0xcc8] sm:$0xff] }
 0x10d   : > { %3507 = vmatprep.subr.bf16.mxu0 %v4581_v26  ;;  %3671 = vmatprep.subr.bf16.mxu1 %v4583_v27  ;;  %v4637_v26 = vcombine.high %v601_v19, %v605_v20  ;;  %v4639_v27 = vcombine.high %v602_v21, %v606_v22  ;;  %v653_v13 = vld [vmem:[%s5292_s22 + $0xce0] sm:$0xff] }
 0x110   : > { %3508 = vmatpush1.bf16.msra.mxu0 %v4580_v63  ;;  %3672 = vmatpush1.bf16.msra.mxu1 %v4582_v33  ;;  %v4636_v63 = vcombine.low %v601_v19, %v605_v20  ;;  %v4638_v33 = vcombine.low %v602_v21, %v606_v22  ;;  %v657_v20 = vld [vmem:[%s5292_s22 + $0xd00] sm:$0xff]  ;;  %v658_v22 = vld [vmem:[%s5292_s22 + $0xd08] sm:$0xff] }
 0x111   : > { %3509 = vmatprep.subr.bf16.mxu0 %v4589_v34  ;;  %3673 = vmatprep.subr.bf16.mxu1 %v4591_v35  ;;  %v4645_v34 = vcombine.high %v609_v28, %v613_v59  ;;  %v4647_v35 = vcombine.high %v610_v30, %v614_v31  ;;  %v661_v21 = vld [vmem:[%s5292_s22 + $0xd20] sm:$0xff] }
 0x114   : > { %3510 = vmatpush1.bf16.msra.mxu0 %v4588_v41  ;;  %3674 = vmatpush1.bf16.msra.mxu1 %v4590_v42  ;;  %v4644_v41 = vcombine.low %v609_v28, %v613_v59  ;;  %v4646_v42 = vcombine.low %v610_v30, %v614_v31  ;;  %v665_v59 = vld [vmem:[%s5292_s22 + $0xd40] sm:$0xff]  ;;  %v666_v31 = vld [vmem:[%s5292_s22 + $0xd48] sm:$0xff] }
 0x115   : > { %3511 = vmatprep.subr.bf16.mxu0 %v4597_v44  ;;  %3675 = vmatprep.subr.bf16.mxu1 %v4599_v45  ;;  %v4653_v44 = vcombine.high %v617_v36, %v621_v37  ;;  %v4655_v45 = vcombine.high %v618_v39, %v622_v40  ;;  %v669_v30 = vld [vmem:[%s5292_s22 + $0xd60] sm:$0xff] }
 0x118   : > { %3512 = vmatpush1.bf16.msra.mxu0 %v4596_v51  ;;  %3676 = vmatpush1.bf16.msra.mxu1 %v4598_v52  ;;  %v4652_v51 = vcombine.low %v617_v36, %v621_v37  ;;  %v4654_v52 = vcombine.low %v618_v39, %v622_v40  ;;  %v673_v37 = vld [vmem:[%s5292_s22 + $0xd80] sm:$0xff]  ;;  %v674_v40 = vld [vmem:[%s5292_s22 + $0xd88] sm:$0xff] }
 0x119   : > { %3513 = vmatprep.subr.bf16.mxu0 %v4605_v54  ;;  %3677 = vmatprep.subr.bf16.mxu1 %v4607_v55  ;;  %v4661_v54 = vcombine.high %v625_v46, %v629_v47  ;;  %v4663_v55 = vcombine.high %v626_v49, %v630_v50  ;;  %v677_v39 = vld [vmem:[%s5292_s22 + $0xda0] sm:$0xff] }
 0x11c   : > { %3514 = vmatpush1.bf16.msra.mxu0 %v4604_v61  ;;  %3678 = vmatpush1.bf16.msra.mxu1 %v4606_v62  ;;  %v638_v61 = vld [vmem:[%s5292_s22 + $0xc68] sm:$0xff]  ;;  %v4660_v62 = vcombine.low %v625_v46, %v629_v47  ;;  %v681_v47 = vld [vmem:[%s5292_s22 + $0xdc0] sm:$0xff] }
 0x11d   : > { %3515 = vmatprep.subr.bf16.mxu0 %v4613_v0  ;;  %3679 = vmatprep.subr.bf16.mxu1 %v4615_v1  ;;  %v4662_v0 = vcombine.low %v626_v49, %v630_v50  ;;  %v4669_v1 = vcombine.high %v633_v56, %v637_v57  ;;  %v4671_v2 = vcombine.high %v634_v60, %v638_v61  ;;  %v685_v49 = vld [vmem:[%s5292_s22 + $0xde0] sm:$0xff]  ;;  %v682_v50 = vld [vmem:[%s5292_s22 + $0xdc8] sm:$0xff] }
 0x120   : > { %3516 = vmatpush1.bf16.msra.mxu0 %v4612_v6  ;;  %3680 = vmatpush1.bf16.msra.mxu1 %v4614_v7  ;;  %v646_v6 = vld [vmem:[%s5292_s22 + $0xca8] sm:$0xff]  ;;  %v4668_v7 = vcombine.low %v633_v56, %v637_v57  ;;  %v689_v57 = vld [vmem:[%s5292_s22 + $0xe00] sm:$0xff] }
 0x121   : > { %3517 = vmatprep.subr.bf16.mxu0 %v4621_v8  ;;  %3681 = vmatprep.subr.bf16.mxu1 %v4623_v10  ;;  %v4670_v8 = vcombine.low %v634_v60, %v638_v61  ;;  %v4677_v10 = vcombine.high %v641_v3, %v645_v4  ;;  %v4679_v11 = vcombine.high %v642_v29, %v646_v6  ;;  %v693_v60 = vld [vmem:[%s5292_s22 + $0xe20] sm:$0xff]  ;;  %v690_v61 = vld [vmem:[%s5292_s22 + $0xe08] sm:$0xff] }
 0x124   : > { %3518 = vmatpush1.bf16.msra.mxu0 %v4620_v15  ;;  %3682 = vmatpush1.bf16.msra.mxu1 %v4622_v16  ;;  %v654_v15 = vld [vmem:[%s5292_s22 + $0xce8] sm:$0xff]  ;;  %v4676_v16 = vcombine.low %v641_v3, %v645_v4  ;;  %v697_v4 = vld [vmem:[%s5292_s22 + $0xe40] sm:$0xff] }
 0x125   : > { %3519 = vmatprep.subr.bf16.mxu0 %v4629_v17  ;;  %3683 = vmatprep.subr.bf16.mxu1 %v4631_v18  ;;  %v4678_v17 = vcombine.low %v642_v29, %v646_v6  ;;  %v4685_v18 = vcombine.high %v649_v12, %v653_v13  ;;  %v4687_v19 = vcombine.high %v650_v14, %v654_v15  ;;  %v701_v29 = vld [vmem:[%s5292_s22 + $0xe60] sm:$0xff]  ;;  %v698_v6 = vld [vmem:[%s5292_s22 + $0xe48] sm:$0xff] }
 0x128   : > { %3520 = vmatpush1.bf16.msra.mxu0 %v4628_v24  ;;  %3684 = vmatpush1.bf16.msra.mxu1 %v4630_v25  ;;  %v662_v24 = vld [vmem:[%s5292_s22 + $0xd28] sm:$0xff]  ;;  %v4684_v25 = vcombine.low %v649_v12, %v653_v13  ;;  %v705_v13 = vld [vmem:[%s5292_s22 + $0xe80] sm:$0xff] }
 0x129   : > { %3521 = vmatprep.subr.bf16.mxu0 %v4637_v26  ;;  %3685 = vmatprep.subr.bf16.mxu1 %v4639_v27  ;;  %v4686_v26 = vcombine.low %v650_v14, %v654_v15  ;;  %v4693_v27 = vcombine.high %v657_v20, %v661_v21  ;;  %v4695_v28 = vcombine.high %v658_v22, %v662_v24  ;;  %v709_v14 = vld [vmem:[%s5292_s22 + $0xea0] sm:$0xff]  ;;  %v706_v15 = vld [vmem:[%s5292_s22 + $0xe88] sm:$0xff] }
 0x12c   : > { %3522 = vmatpush1.bf16.msra.mxu0 %v4636_v63  ;;  %3686 = vmatpush1.bf16.msra.mxu1 %v4638_v33  ;;  %v670_v63 = vld [vmem:[%s5292_s22 + $0xd68] sm:$0xff]  ;;  %v4692_v33 = vcombine.low %v657_v20, %v661_v21  ;;  %v713_v21 = vld [vmem:[%s5292_s22 + $0xec0] sm:$0xff] }
 0x12d   : > { %3523 = vmatprep.subr.bf16.mxu0 %v4645_v34  ;;  %3687 = vmatprep.subr.bf16.mxu1 %v4647_v35  ;;  %v4694_v34 = vcombine.low %v658_v22, %v662_v24  ;;  %v4701_v35 = vcombine.high %v665_v59, %v669_v30  ;;  %v4703_v36 = vcombine.high %v666_v31, %v670_v63  ;;  %v717_v22 = vld [vmem:[%s5292_s22 + $0xee0] sm:$0xff]  ;;  %v714_v24 = vld [vmem:[%s5292_s22 + $0xec8] sm:$0xff] }
 0x130   : > { %3524 = vmatpush1.bf16.msra.mxu0 %v4644_v41  ;;  %3688 = vmatpush1.bf16.msra.mxu1 %v4646_v42  ;;  %v678_v41 = vld [vmem:[%s5292_s22 + $0xda8] sm:$0xff]  ;;  %v4700_v42 = vcombine.low %v665_v59, %v669_v30  ;;  %v721_v30 = vld [vmem:[%s5292_s22 + $0xf00] sm:$0xff] }
 0x131   : > { %3525 = vmatprep.subr.bf16.mxu0 %v4653_v44  ;;  %3689 = vmatprep.subr.bf16.mxu1 %v4655_v45  ;;  %v4702_v44 = vcombine.low %v666_v31, %v670_v63  ;;  %v4709_v45 = vcombine.high %v673_v37, %v677_v39  ;;  %v4711_v46 = vcombine.high %v674_v40, %v678_v41  ;;  %v725_v31 = vld [vmem:[%s5292_s22 + $0xf20] sm:$0xff]  ;;  %v722_v63 = vld [vmem:[%s5292_s22 + $0xf08] sm:$0xff] }
 0x134   : > { %3526 = vmatpush1.bf16.msra.mxu0 %v4652_v51  ;;  %3690 = vmatpush1.bf16.msra.mxu1 %v4654_v52  ;;  %v686_v51 = vld [vmem:[%s5292_s22 + $0xde8] sm:$0xff]  ;;  %v4708_v52 = vcombine.low %v673_v37, %v677_v39  ;;  %v729_v39 = vld [vmem:[%s5292_s22 + $0xf40] sm:$0xff] }
 0x135   : > { %3536 = vmatprep.subr.bf16.mxu0 %v4661_v54  ;;  %3700 = vmatprep.subr.bf16.mxu1 %v4663_v55  ;;  %v4710_v54 = vcombine.low %v674_v40, %v678_v41  ;;  %v4717_v55 = vcombine.high %v681_v47, %v685_v49  ;;  %v4719_v56 = vcombine.high %v682_v50, %v686_v51  ;;  %v733_v40 = vld [vmem:[%s5292_s22 + $0xf60] sm:$0xff]  ;;  %v730_v41 = vld [vmem:[%s5292_s22 + $0xf48] sm:$0xff] }
 0x137   : > { %3528 = vmatmul.mubr.bf16.vlgmr.msra.gmra.mrb[0].mxu0 %v5546_v58  ;;  %3692 = vmatmul.mubr.bf16.vlgmr.msra.gmra.mrb[0].mxu1 %v5546_v58 }
 0x138   : > { %3537 = vmatpush1.bf16.msra.mxu0 %v4660_v62  ;;  %3701 = vmatpush1.bf16.msra.mxu1 %v4662_v0  ;;  %v694_v62 = vld [vmem:[%s5292_s22 + $0xe28] sm:$0xff]  ;;  %v4716_v0 = vcombine.low %v681_v47, %v685_v49  ;;  %v737_v49 = vld [vmem:[%s5292_s22 + $0xf80] sm:$0xff] }
 0x139   : > { %3538 = vmatprep.subr.bf16.mxu0 %v4669_v1  ;;  %3702 = vmatprep.subr.bf16.mxu1 %v4671_v2  ;;  %v4718_v1 = vcombine.low %v682_v50, %v686_v51  ;;  %v4725_v2 = vcombine.high %v689_v57, %v693_v60  ;;  %v4727_v3 = vcombine.high %v690_v61, %v694_v62  ;;  %v741_v50 = vld [vmem:[%s5292_s22 + $0xfa0] sm:$0xff]  ;;  %v738_v51 = vld [vmem:[%s5292_s22 + $0xf88] sm:$0xff] }
 0x13a   : > { %3568 = vmatprep.mubr.bf16.mxu0 %v5554_v5  ;;  %3732 = vmatprep.mubr.bf16.mxu1 %v5554_v5 }
 0x13c   : > { %3539 = vmatpush1.bf16.msra.mxu0 %v4668_v7  ;;  %3703 = vmatpush1.bf16.msra.mxu1 %v4670_v8  ;;  %v702_v7 = vld [vmem:[%s5292_s22 + $0xe68] sm:$0xff]  ;;  %v4724_v8 = vcombine.low %v689_v57, %v693_v60  ;;  %v745_v60 = vld [vmem:[%s5292_s22 + $0xfc0] sm:$0xff] }
 0x13d   : > { %3540 = vmatprep.subr.bf16.mxu0 %v4677_v10  ;;  %3704 = vmatprep.subr.bf16.mxu1 %v4679_v11  ;;  %v4726_v10 = vcombine.low %v690_v61, %v694_v62  ;;  %v4733_v11 = vcombine.high %v697_v4, %v701_v29  ;;  %v4735_v12 = vcombine.high %v698_v6, %v702_v7  ;;  %v749_v61 = vld [vmem:[%s5292_s22 + $0xfe0] sm:$0xff]  ;;  %v746_v62 = vld [vmem:[%s5292_s22 + $0xfc8] sm:$0xff] }
 0x140   : > { %3541 = vmatpush1.bf16.msra.mxu0 %v4676_v16  ;;  %3705 = vmatpush1.bf16.msra.mxu1 %v4678_v17  ;;  %v710_v16 = vld [vmem:[%s5292_s22 + $0xea8] sm:$0xff]  ;;  %v4732_v17 = vcombine.low %v697_v4, %v701_v29  ;;  %v243_v29 = vld [vmem:[%s5292_s22 + $0x10] sm:$0xff] }
 0x141   : > { %3542 = vmatprep.subr.bf16.mxu0 %v4685_v18  ;;  %3706 = vmatprep.subr.bf16.mxu1 %v4687_v19  ;;  %v4734_v18 = vcombine.low %v698_v6, %v702_v7  ;;  %v4741_v19 = vcombine.high %v705_v13, %v709_v14  ;;  %v4743_v20 = vcombine.high %v706_v15, %v710_v16  ;;  %v247_v6 = vld [vmem:[%s5292_s22 + $0x30] sm:$0xff]  ;;  %v244_v7 = vld [vmem:[%s5292_s22 + $0x18] sm:$0xff] }
 0x144   : > { %3543 = vmatpush1.bf16.msra.mxu0 %v4684_v25  ;;  %3707 = vmatpush1.bf16.msra.mxu1 %v4686_v26  ;;  %v718_v25 = vld [vmem:[%s5292_s22 + $0xee8] sm:$0xff]  ;;  %v4740_v26 = vcombine.low %v705_v13, %v709_v14  ;;  %v251_v14 = vld [vmem:[%s5292_s22 + $0x50] sm:$0xff] }
 0x145   : > { %3544 = vmatprep.subr.bf16.mxu0 %v4693_v27  ;;  %3708 = vmatprep.subr.bf16.mxu1 %v4695_v28  ;;  %v4742_v27 = vcombine.low %v706_v15, %v710_v16  ;;  %v4749_v28 = vcombine.high %v713_v21, %v717_v22  ;;  %v4751_v59 = vcombine.high %v714_v24, %v718_v25  ;;  %v255_v15 = vld [vmem:[%s5292_s22 + $0x70] sm:$0xff] }
 0x146   : > { %v5622_v16 = vcombine.high %v5546_v58, %v5546_v58 }
 0x148   : > { %3545 = vmatpush1.bf16.msra.mxu0 %v4692_v33  ;;  %3709 = vmatpush1.bf16.msra.mxu1 %v4694_v34  ;;  %v726_v33 = vld [vmem:[%s5292_s22 + $0xf28] sm:$0xff]  ;;  %v4748_v34 = vcombine.low %v713_v21, %v717_v22  ;;  %v4289_v21 = vcombine.high %v251_v14, %v255_v15 }
 0x149   : > { %3546 = vmatprep.subr.bf16.mxu0 %v4701_v35  ;;  %3710 = vmatprep.subr.bf16.mxu1 %v4703_v36  ;;  %v4750_v35 = vcombine.low %v714_v24, %v718_v25  ;;  %v4757_v36 = vcombine.high %v721_v30, %v725_v31  ;;  %v4759_v37 = vcombine.high %v722_v63, %v726_v33  ;;  %v259_v24 = vld [vmem:[%s5292_s22 + $0x90] sm:$0xff] }
 0x14a   : > { %v263_v25 = vld [vmem:[%s5292_s22 + $0xb0] sm:$0xff] }
 0x14c   : > { %3547 = vmatpush1.bf16.msra.mxu0 %v4700_v42  ;;  %3711 = vmatpush1.bf16.msra.mxu1 %v4702_v44  ;;  %v734_v42 = vld [vmem:[%s5292_s22 + $0xf68] sm:$0xff]  ;;  %v4756_v44 = vcombine.low %v721_v30, %v725_v31  ;;  %v4297_v30 = vcombine.high %v259_v24, %v263_v25 }
 0x14d   : > { %3548 = vmatprep.subr.bf16.mxu0 %v4709_v45  ;;  %3712 = vmatprep.subr.bf16.mxu1 %v4711_v46  ;;  %v4758_v45 = vcombine.low %v722_v63, %v726_v33  ;;  %v4765_v46 = vcombine.high %v729_v39, %v733_v40  ;;  %v4767_v47 = vcombine.high %v730_v41, %v734_v42  ;;  %v267_v63 = vld [vmem:[%s5292_s22 + $0xd0] sm:$0xff] }
 0x14e   : > { %v271_v33 = vld [vmem:[%s5292_s22 + $0xf0] sm:$0xff] }
 0x150   : > { %3549 = vmatpush1.bf16.msra.mxu0 %v4708_v52  ;;  %3713 = vmatpush1.bf16.msra.mxu1 %v4710_v54  ;;  %v742_v52 = vld [vmem:[%s5292_s22 + $0xfa8] sm:$0xff]  ;;  %v4764_v54 = vcombine.low %v729_v39, %v733_v40  ;;  %v4305_v39 = vcombine.high %v267_v63, %v271_v33 }
 0x151   : > { %3550 = vmatprep.subr.bf16.mxu0 %v4717_v55  ;;  %3714 = vmatprep.subr.bf16.mxu1 %v4719_v56  ;;  %v4766_v55 = vcombine.low %v730_v41, %v734_v42  ;;  %v4773_v56 = vcombine.high %v737_v49, %v741_v50  ;;  %v4775_v57 = vcombine.high %v738_v51, %v742_v52  ;;  %v275_v41 = vld [vmem:[%s5292_s22 + $0x110] sm:$0xff] }
 0x152   : > { %v279_v42 = vld [vmem:[%s5292_s22 + $0x130] sm:$0xff] }
 0x154   : > { %3551 = vmatpush1.bf16.msra.mxu0 %v4716_v0  ;;  %3715 = vmatpush1.bf16.msra.mxu1 %v4718_v1  ;;  %v750_v0 = vld [vmem:[%s5292_s22 + $0xfe8] sm:$0xff]  ;;  %v4772_v1 = vcombine.low %v737_v49, %v741_v50  ;;  %v283_v50 = vld [vmem:[%s5292_s22 + $0x150] sm:$0xff] }
 0x155   : > { %3552 = vmatprep.subr.bf16.mxu0 %v4725_v2  ;;  %3716 = vmatprep.subr.bf16.mxu1 %v4727_v3  ;;  %v4774_v2 = vcombine.low %v738_v51, %v742_v52  ;;  %v4781_v3 = vcombine.high %v745_v60, %v749_v61  ;;  %v4783_v4 = vcombine.high %v746_v62, %v750_v0  ;;  %v287_v51 = vld [vmem:[%s5292_s22 + $0x170] sm:$0xff]  ;;  %v284_v52 = vld [vmem:[%s5292_s22 + $0x158] sm:$0xff] }
 0x158   : > { %3553 = vmatpush1.bf16.msra.mxu0 %v4724_v8  ;;  %3717 = vmatpush1.bf16.msra.mxu1 %v4726_v10  ;;  %v248_v8 = vld [vmem:[%s5292_s22 + $0x38] sm:$0xff]  ;;  %v4780_v10 = vcombine.low %v745_v60, %v749_v61  ;;  %v291_v61 = vld [vmem:[%s5292_s22 + $0x190] sm:$0xff] }
 0x159   : > { %3554 = vmatprep.subr.bf16.mxu0 %v4733_v11  ;;  %3718 = vmatprep.subr.bf16.mxu1 %v4735_v12  ;;  %v4782_v11 = vcombine.low %v746_v62, %v750_v0  ;;  %v4281_v12 = vcombine.high %v243_v29, %v247_v6  ;;  %v4283_v13 = vcombine.high %v244_v7, %v248_v8  ;;  %v295_v62 = vld [vmem:[%s5292_s22 + $0x1b0] sm:$0xff]  ;;  %v292_v0 = vld [vmem:[%s5292_s22 + $0x198] sm:$0xff] }
 0x15c   : > { %3555 = vmatpush1.bf16.msra.mxu0 %v4732_v17  ;;  %3719 = vmatpush1.bf16.msra.mxu1 %v4734_v18  ;;  %v252_v17 = vld [vmem:[%s5292_s22 + $0x58] sm:$0xff] }
 0x15d   : > { %3556 = vmatprep.subr.bf16.mxu0 %v4741_v19  ;;  %3720 = vmatprep.subr.bf16.mxu1 %v4743_v20  ;;  %v256_v18 = vld [vmem:[%s5292_s22 + $0x78] sm:$0xff]  ;;  %v4280_v19 = vcombine.low %v243_v29, %v247_v6  ;;  %v4282_v20 = vcombine.low %v244_v7, %v248_v8  ;;  %v299_v6 = vld [vmem:[%s5292_s22 + $0x1d0] sm:$0xff] }
 0x15e   : > { %v4291_v22 = vcombine.high %v252_v17, %v256_v18  ;;  %v303_v7 = vld [vmem:[%s5292_s22 + $0x1f0] sm:$0xff]  ;;  %v300_v8 = vld [vmem:[%s5292_s22 + $0x1d8] sm:$0xff] }
 0x160   : > { %3557 = vmatpush1.bf16.msra.mxu0 %v4740_v26  ;;  %3721 = vmatpush1.bf16.msra.mxu1 %v4742_v27  ;;  %v260_v26 = vld [vmem:[%s5292_s22 + $0x98] sm:$0xff] }
 0x161   : > { %3558 = vmatprep.subr.bf16.mxu0 %v4749_v28  ;;  %3722 = vmatprep.subr.bf16.mxu1 %v4751_v59  ;;  %v264_v27 = vld [vmem:[%s5292_s22 + $0xb8] sm:$0xff]  ;;  %v4288_v28 = vcombine.low %v251_v14, %v255_v15  ;;  %v4290_v59 = vcombine.low %v252_v17, %v256_v18  ;;  %v307_v15 = vld [vmem:[%s5292_s22 + $0x210] sm:$0xff] }
 0x162   : > { %v4299_v31 = vcombine.high %v260_v26, %v264_v27  ;;  %v311_v17 = vld [vmem:[%s5292_s22 + $0x230] sm:$0xff]  ;;  %v308_v18 = vld [vmem:[%s5292_s22 + $0x218] sm:$0xff] }
 0x164   : > { %3559 = vmatpush1.bf16.msra.mxu0 %v4748_v34  ;;  %3723 = vmatpush1.bf16.msra.mxu1 %v4750_v35  ;;  %v268_v34 = vld [vmem:[%s5292_s22 + $0xd8] sm:$0xff] }
 0x165   : > { %3560 = vmatprep.subr.bf16.mxu0 %v4757_v36  ;;  %3724 = vmatprep.subr.bf16.mxu1 %v4759_v37  ;;  %v272_v35 = vld [vmem:[%s5292_s22 + $0xf8] sm:$0xff]  ;;  %v4296_v36 = vcombine.low %v259_v24, %v263_v25  ;;  %v4298_v37 = vcombine.low %v260_v26, %v264_v27  ;;  %v315_v25 = vld [vmem:[%s5292_s22 + $0x250] sm:$0xff] }
 0x166   : > { %v4307_v40 = vcombine.high %v268_v34, %v272_v35  ;;  %v319_v26 = vld [vmem:[%s5292_s22 + $0x270] sm:$0xff]  ;;  %v316_v27 = vld [vmem:[%s5292_s22 + $0x258] sm:$0xff] }
 0x168   : > { %3561 = vmatpush1.bf16.msra.mxu0 %v4756_v44  ;;  %3725 = vmatpush1.bf16.msra.mxu1 %v4758_v45  ;;  %v276_v44 = vld [vmem:[%s5292_s22 + $0x118] sm:$0xff] }
 0x169   : > { %3562 = vmatprep.subr.bf16.mxu0 %v4765_v46  ;;  %3726 = vmatprep.subr.bf16.mxu1 %v4767_v47  ;;  %v280_v45 = vld [vmem:[%s5292_s22 + $0x138] sm:$0xff]  ;;  %v4304_v46 = vcombine.low %v267_v63, %v271_v33  ;;  %v4313_v47 = vcombine.high %v275_v41, %v279_v42  ;;  %v323_v33 = vld [vmem:[%s5292_s22 + $0x290] sm:$0xff] }
 0x16a   : > { %v4315_v49 = vcombine.high %v276_v44, %v280_v45 }
 0x16c   : > { %3563 = vmatpush1.bf16.msra.mxu0 %v4764_v54  ;;  %3727 = vmatpush1.bf16.msra.mxu1 %v4766_v55  ;;  %v288_v54 = vld [vmem:[%s5292_s22 + $0x178] sm:$0xff]  ;;  %v4312_v55 = vcombine.low %v275_v41, %v279_v42  ;;  %v331_v42 = vld [vmem:[%s5292_s22 + $0x2d0] sm:$0xff] }
 0x16d   : > { %3564 = vmatprep.subr.bf16.mxu0 %v4773_v56  ;;  %3728 = vmatprep.subr.bf16.mxu1 %v4775_v57  ;;  %v4314_v56 = vcombine.low %v276_v44, %v280_v45  ;;  %v4321_v57 = vcombine.high %v283_v50, %v287_v51  ;;  %v4323_v60 = vcombine.high %v284_v52, %v288_v54  ;;  %v335_v44 = vld [vmem:[%s5292_s22 + $0x2f0] sm:$0xff]  ;;  %v332_v45 = vld [vmem:[%s5292_s22 + $0x2d8] sm:$0xff] }
 0x170   : > { %3565 = vmatpush1.bf16.msra.mxu0 %v4772_v1  ;;  %3729 = vmatpush1.bf16.msra.mxu1 %v4774_v2  ;;  %v296_v1 = vld [vmem:[%s5292_s22 + $0x1b8] sm:$0xff]  ;;  %v4320_v2 = vcombine.low %v283_v50, %v287_v51  ;;  %v339_v51 = vld [vmem:[%s5292_s22 + $0x310] sm:$0xff] }
 0x171   : > { %3566 = vmatprep.subr.bf16.mxu0 %v4781_v3  ;;  %3730 = vmatprep.subr.bf16.mxu1 %v4783_v4  ;;  %v4322_v3 = vcombine.low %v284_v52, %v288_v54  ;;  %v4329_v4 = vcombine.high %v291_v61, %v295_v62  ;;  %v4331_v29 = vcombine.high %v292_v0, %v296_v1  ;;  %v343_v52 = vld [vmem:[%s5292_s22 + $0x330] sm:$0xff]  ;;  %v340_v54 = vld [vmem:[%s5292_s22 + $0x318] sm:$0xff] }
 0x174   : > { %3567 = vmatpush1.bf16.msra.mxu0 %v4780_v10  ;;  %3731 = vmatpush1.bf16.msra.mxu1 %v4782_v11  ;;  %v304_v10 = vld [vmem:[%s5292_s22 + $0x1f8] sm:$0xff]  ;;  %v4328_v11 = vcombine.low %v291_v61, %v295_v62  ;;  %v347_v62 = vld [vmem:[%s5292_s22 + $0x350] sm:$0xff] }
 0x175   : > { %3741 = vmatprep.subr.bf16.mxu0 %v4281_v12  ;;  %3905 = vmatprep.subr.bf16.mxu1 %v4283_v13  ;;  %v4330_v12 = vcombine.low %v292_v0, %v296_v1  ;;  %v4337_v13 = vcombine.high %v299_v6, %v303_v7  ;;  %v4339_v14 = vcombine.high %v300_v8, %v304_v10  ;;  %v351_v0 = vld [vmem:[%s5292_s22 + $0x370] sm:$0xff]  ;;  %v348_v1 = vld [vmem:[%s5292_s22 + $0x358] sm:$0xff] }
 0x177   : > { %3569 = vmatmul.mubr.bf16.vlgmr.msra.gmra.mrb[0].mxu0 %v5622_v16  ;;  %3733 = vmatmul.mubr.bf16.vlgmr.msra.gmra.mrb[0].mxu1 %v5622_v16 }
 0x178   : > { %3742 = vmatpush1.bf16.msra.mxu0 %v4280_v19  ;;  %3906 = vmatpush1.bf16.msra.mxu1 %v4282_v20  ;;  %v312_v19 = vld [vmem:[%s5292_s22 + $0x238] sm:$0xff]  ;;  %v4336_v20 = vcombine.low %v299_v6, %v303_v7  ;;  %v355_v7 = vld [vmem:[%s5292_s22 + $0x390] sm:$0xff] }
 0x179   : > { %3743 = vmatprep.subr.bf16.mxu0 %v4289_v21  ;;  %3907 = vmatprep.subr.bf16.mxu1 %v4291_v22  ;;  %v4338_v21 = vcombine.low %v300_v8, %v304_v10  ;;  %v4345_v22 = vcombine.high %v307_v15, %v311_v17  ;;  %v4347_v24 = vcombine.high %v308_v18, %v312_v19  ;;  %v359_v8 = vld [vmem:[%s5292_s22 + $0x3b0] sm:$0xff]  ;;  %v356_v10 = vld [vmem:[%s5292_s22 + $0x398] sm:$0xff] }
 0x17a   : > { %3773 = vmatprep.mubr.bf16.mxu0 %v5346_v9  ;;  %3937 = vmatprep.mubr.bf16.mxu1 %v5346_v9  ;;  %v4306_v9 = vcombine.low %v268_v34, %v272_v35  ;;  %v327_v34 = vld [vmem:[%s5292_s22 + $0x2b0] sm:$0xff]  ;;  %v324_v35 = vld [vmem:[%s5292_s22 + $0x298] sm:$0xff] }
 0x17c   : > { %3744 = vmatpush1.bf16.msra.mxu0 %v4288_v28  ;;  %3908 = vmatpush1.bf16.msra.mxu1 %v4290_v59  ;;  %v320_v28 = vld [vmem:[%s5292_s22 + $0x278] sm:$0xff]  ;;  %v4344_v59 = vcombine.low %v307_v15, %v311_v17  ;;  %v363_v17 = vld [vmem:[%s5292_s22 + $0x3d0] sm:$0xff] }
 0x17d   : > { %3745 = vmatprep.subr.bf16.mxu0 %v4297_v30  ;;  %3909 = vmatprep.subr.bf16.mxu1 %v4299_v31  ;;  %v4346_v30 = vcombine.low %v308_v18, %v312_v19  ;;  %v4353_v31 = vcombine.high %v315_v25, %v319_v26  ;;  %v4355_v63 = vcombine.high %v316_v27, %v320_v28  ;;  %v367_v18 = vld [vmem:[%s5292_s22 + $0x3f0] sm:$0xff]  ;;  %v364_v19 = vld [vmem:[%s5292_s22 + $0x3d8] sm:$0xff] }
 0x180   : > { %3746 = vmatpush1.bf16.msra.mxu0 %v4296_v36  ;;  %3910 = vmatpush1.bf16.msra.mxu1 %v4298_v37  ;;  %v328_v36 = vld [vmem:[%s5292_s22 + $0x2b8] sm:$0xff]  ;;  %v4352_v37 = vcombine.low %v315_v25, %v319_v26  ;;  %v371_v26 = vld [vmem:[%s5292_s22 + $0x410] sm:$0xff] }
 0x181   : > { %3747 = vmatprep.subr.bf16.mxu0 %v4305_v39  ;;  %3911 = vmatprep.subr.bf16.mxu1 %v4307_v40  ;;  %v4354_v39 = vcombine.low %v316_v27, %v320_v28  ;;  %v4361_v40 = vcombine.high %v323_v33, %v327_v34  ;;  %v4363_v41 = vcombine.high %v324_v35, %v328_v36  ;;  %v375_v27 = vld [vmem:[%s5292_s22 + $0x430] sm:$0xff]  ;;  %v372_v28 = vld [vmem:[%s5292_s22 + $0x418] sm:$0xff] }
 0x184   : > { %3748 = vmatpush1.bf16.msra.mxu0 %v4304_v46  ;;  %3912 = vmatpush1.bf16.msra.mxu1 %v4306_v9  ;;  %v336_v46 = vld [vmem:[%s5292_s22 + $0x2f8] sm:$0xff]  ;;  %v4360_v9 = vcombine.low %v323_v33, %v327_v34  ;;  %v379_v34 = vld [vmem:[%s5292_s22 + $0x450] sm:$0xff] }
 0x185   : > { %3749 = vmatprep.subr.bf16.mxu0 %v4313_v47  ;;  %3913 = vmatprep.subr.bf16.mxu1 %v4315_v49  ;;  %v4362_v47 = vcombine.low %v324_v35, %v328_v36  ;;  %v4369_v49 = vcombine.high %v331_v42, %v335_v44  ;;  %v4371_v50 = vcombine.high %v332_v45, %v336_v46  ;;  %v383_v35 = vld [vmem:[%s5292_s22 + $0x470] sm:$0xff]  ;;  %v380_v36 = vld [vmem:[%s5292_s22 + $0x458] sm:$0xff] }
 0x188   : > { %3750 = vmatpush1.bf16.msra.mxu0 %v4312_v55  ;;  %3914 = vmatpush1.bf16.msra.mxu1 %v4314_v56  ;;  %v344_v55 = vld [vmem:[%s5292_s22 + $0x338] sm:$0xff]  ;;  %v4368_v56 = vcombine.low %v331_v42, %v335_v44  ;;  %v387_v44 = vld [vmem:[%s5292_s22 + $0x490] sm:$0xff] }
 0x189   : > { %3751 = vmatprep.subr.bf16.mxu0 %v4321_v57  ;;  %3915 = vmatprep.subr.bf16.mxu1 %v4323_v60  ;;  %v4370_v57 = vcombine.low %v332_v45, %v336_v46  ;;  %v4377_v60 = vcombine.high %v339_v51, %v343_v52  ;;  %v4379_v61 = vcombine.high %v340_v54, %v344_v55  ;;  %v391_v45 = vld [vmem:[%s5292_s22 + $0x4b0] sm:$0xff]  ;;  %v388_v46 = vld [vmem:[%s5292_s22 + $0x498] sm:$0xff] }
 0x18c   : > { %3752 = vmatpush1.bf16.msra.mxu0 %v4320_v2  ;;  %3916 = vmatpush1.bf16.msra.mxu1 %v4322_v3  ;;  %v352_v2 = vld [vmem:[%s5292_s22 + $0x378] sm:$0xff]  ;;  %v4376_v3 = vcombine.low %v339_v51, %v343_v52  ;;  %v395_v52 = vld [vmem:[%s5292_s22 + $0x4d0] sm:$0xff] }
 0x18d   : > { %3753 = vmatprep.subr.bf16.mxu0 %v4329_v4  ;;  %3917 = vmatprep.subr.bf16.mxu1 %v4331_v29  ;;  %v4378_v4 = vcombine.low %v340_v54, %v344_v55  ;;  %v4385_v29 = vcombine.high %v347_v62, %v351_v0  ;;  %v4387_v6 = vcombine.high %v348_v1, %v352_v2  ;;  %v399_v54 = vld [vmem:[%s5292_s22 + $0x4f0] sm:$0xff]  ;;  %v396_v55 = vld [vmem:[%s5292_s22 + $0x4d8] sm:$0xff] }
 0x190   : > { %3754 = vmatpush1.bf16.msra.mxu0 %v4328_v11  ;;  %3918 = vmatpush1.bf16.msra.mxu1 %v4330_v12  ;;  %v360_v11 = vld [vmem:[%s5292_s22 + $0x3b8] sm:$0xff]  ;;  %v4384_v12 = vcombine.low %v347_v62, %v351_v0  ;;  %v403_v62 = vld [vmem:[%s5292_s22 + $0x510] sm:$0xff] }
 0x191   : > { %3755 = vmatprep.subr.bf16.mxu0 %v4337_v13  ;;  %3919 = vmatprep.subr.bf16.mxu1 %v4339_v14  ;;  %v4386_v13 = vcombine.low %v348_v1, %v352_v2  ;;  %v4393_v14 = vcombine.high %v355_v7, %v359_v8  ;;  %v4395_v15 = vcombine.high %v356_v10, %v360_v11  ;;  %v407_v0 = vld [vmem:[%s5292_s22 + $0x530] sm:$0xff]  ;;  %v404_v1 = vld [vmem:[%s5292_s22 + $0x518] sm:$0xff] }
 0x192   : > { %v408_v2 = vld [vmem:[%s5292_s22 + $0x538] sm:$0xff] }
 0x194   : > { %3756 = vmatpush1.bf16.msra.mxu0 %v4336_v20  ;;  %3920 = vmatpush1.bf16.msra.mxu1 %v4338_v21  ;;  %v368_v20 = vld [vmem:[%s5292_s22 + $0x3f8] sm:$0xff]  ;;  %v4392_v21 = vcombine.low %v355_v7, %v359_v8  ;;  %v415_v7 = vld [vmem:[%s5292_s22 + $0x570] sm:$0xff] }
 0x195   : > { %3757 = vmatprep.subr.bf16.mxu0 %v4345_v22  ;;  %3921 = vmatprep.subr.bf16.mxu1 %v4347_v24  ;;  %v4394_v22 = vcombine.low %v356_v10, %v360_v11  ;;  %v4401_v24 = vcombine.high %v363_v17, %v367_v18  ;;  %v4403_v25 = vcombine.high %v364_v19, %v368_v20  ;;  %v412_v8 = vld [vmem:[%s5292_s22 + $0x558] sm:$0xff] }
 0x196   : > { %v416_v10 = vld [vmem:[%s5292_s22 + $0x578] sm:$0xff]  ;;  %v4440_v11 = vcombine.low %v403_v62, %v407_v0 }
 0x198   : > { %3758 = vmatpush1.bf16.msra.mxu0 %v4344_v59  ;;  %3922 = vmatpush1.bf16.msra.mxu1 %v4346_v30  ;;  %v376_v59 = vld [vmem:[%s5292_s22 + $0x438] sm:$0xff]  ;;  %v4400_v30 = vcombine.low %v363_v17, %v367_v18  ;;  %v423_v17 = vld [vmem:[%s5292_s22 + $0x5b0] sm:$0xff] }
 0x199   : > { %3759 = vmatprep.subr.bf16.mxu0 %v4353_v31  ;;  %3923 = vmatprep.subr.bf16.mxu1 %v4355_v63  ;;  %v4402_v31 = vcombine.low %v364_v19, %v368_v20  ;;  %v4409_v63 = vcombine.high %v371_v26, %v375_v27  ;;  %v4411_v33 = vcombine.high %v372_v28, %v376_v59  ;;  %v420_v18 = vld [vmem:[%s5292_s22 + $0x598] sm:$0xff] }
 0x19a   : > { %v424_v19 = vld [vmem:[%s5292_s22 + $0x5b8] sm:$0xff] }
 0x19c   : > { %3760 = vmatpush1.bf16.msra.mxu0 %v4352_v37  ;;  %3924 = vmatpush1.bf16.msra.mxu1 %v4354_v39  ;;  %v384_v37 = vld [vmem:[%s5292_s22 + $0x478] sm:$0xff]  ;;  %v4408_v39 = vcombine.low %v371_v26, %v375_v27  ;;  %v431_v26 = vld [vmem:[%s5292_s22 + $0x5f0] sm:$0xff] }
 0x19d   : > { %3761 = vmatprep.subr.bf16.mxu0 %v4361_v40  ;;  %3925 = vmatprep.subr.bf16.mxu1 %v4363_v41  ;;  %v4410_v40 = vcombine.low %v372_v28, %v376_v59  ;;  %v4417_v41 = vcombine.high %v379_v34, %v383_v35  ;;  %v4419_v42 = vcombine.high %v380_v36, %v384_v37  ;;  %v428_v27 = vld [vmem:[%s5292_s22 + $0x5d8] sm:$0xff] }
 0x19e   : > { %v432_v28 = vld [vmem:[%s5292_s22 + $0x5f8] sm:$0xff] }
 0x1a0   : > { %3762 = vmatpush1.bf16.msra.mxu0 %v4360_v9  ;;  %3926 = vmatpush1.bf16.msra.mxu1 %v4362_v47  ;;  %v392_v9 = vld [vmem:[%s5292_s22 + $0x4b8] sm:$0xff]  ;;  %v4416_v47 = vcombine.low %v379_v34, %v383_v35  ;;  %v439_v34 = vld [vmem:[%s5292_s22 + $0x630] sm:$0xff] }
 0x1a1   : > { %3763 = vmatprep.subr.bf16.mxu0 %v4369_v49  ;;  %3927 = vmatprep.subr.bf16.mxu1 %v4371_v50  ;;  %v4418_v49 = vcombine.low %v380_v36, %v384_v37  ;;  %v4425_v50 = vcombine.high %v387_v44, %v391_v45  ;;  %v4427_v51 = vcombine.high %v388_v46, %v392_v9  ;;  %v436_v35 = vld [vmem:[%s5292_s22 + $0x618] sm:$0xff] }
 0x1a2   : > { %v440_v36 = vld [vmem:[%s5292_s22 + $0x638] sm:$0xff] }
 0x1a4   : > { %3764 = vmatpush1.bf16.msra.mxu0 %v4368_v56  ;;  %3928 = vmatpush1.bf16.msra.mxu1 %v4370_v57  ;;  %v400_v56 = vld [vmem:[%s5292_s22 + $0x4f8] sm:$0xff]  ;;  %v4426_v57 = vcombine.low %v388_v46, %v392_v9 }
 0x1a5   : > { %3765 = vmatprep.subr.bf16.mxu0 %v4377_v60  ;;  %3929 = vmatprep.subr.bf16.mxu1 %v4379_v61  ;;  %v4433_v60 = vcombine.high %v395_v52, %v399_v54  ;;  %v4435_v61 = vcombine.high %v396_v55, %v400_v56  ;;  %v448_v46 = vld [vmem:[%s5292_s22 + $0x678] sm:$0xff] }
 0x1a8   : > { %3766 = vmatpush1.bf16.msra.mxu0 %v4376_v3  ;;  %3930 = vmatpush1.bf16.msra.mxu1 %v4378_v4  ;;  %v4432_v3 = vcombine.low %v395_v52, %v399_v54  ;;  %v4441_v4 = vcombine.high %v403_v62, %v407_v0  ;;  %v455_v52 = vld [vmem:[%s5292_s22 + $0x6b0] sm:$0xff]  ;;  %v452_v54 = vld [vmem:[%s5292_s22 + $0x698] sm:$0xff] }
 0x1a9   : > { %3767 = vmatprep.subr.bf16.mxu0 %v4385_v29  ;;  %3931 = vmatprep.subr.bf16.mxu1 %v4387_v6  ;;  %v4443_v29 = vcombine.high %v404_v1, %v408_v2  ;;  %v411_v6 = vld [vmem:[%s5292_s22 + $0x550] sm:$0xff]  ;;  %v460_v0 = vld [vmem:[%s5292_s22 + $0x6d8] sm:$0xff] }
 0x1aa   : > { %v4448_v20 = vcombine.low %v411_v6, %v415_v7  ;;  %v463_v62 = vld [vmem:[%s5292_s22 + $0x6f0] sm:$0xff] }
 0x1ac   : > { %3768 = vmatpush1.bf16.msra.mxu0 %v4384_v12  ;;  %3932 = vmatpush1.bf16.msra.mxu1 %v4386_v13  ;;  %v4442_v12 = vcombine.low %v404_v1, %v408_v2  ;;  %v4449_v13 = vcombine.high %v411_v6, %v415_v7  ;;  %v464_v1 = vld [vmem:[%s5292_s22 + $0x6f8] sm:$0xff]  ;;  %v471_v6 = vld [vmem:[%s5292_s22 + $0x730] sm:$0xff] }
 0x1ad   : > { %3769 = vmatprep.subr.bf16.mxu0 %v4393_v14  ;;  %3933 = vmatprep.subr.bf16.mxu1 %v4395_v15  ;;  %v4451_v14 = vcombine.high %v412_v8, %v416_v10  ;;  %v419_v15 = vld [vmem:[%s5292_s22 + $0x590] sm:$0xff]  ;;  %v468_v7 = vld [vmem:[%s5292_s22 + $0x718] sm:$0xff] }
 0x1ae   : > { %v4456_v59 = vcombine.low %v419_v15, %v423_v17 }
 0x1b0   : > { %3770 = vmatpush1.bf16.msra.mxu0 %v4392_v21  ;;  %3934 = vmatpush1.bf16.msra.mxu1 %v4394_v22  ;;  %v4450_v21 = vcombine.low %v412_v8, %v416_v10  ;;  %v4457_v22 = vcombine.high %v419_v15, %v423_v17  ;;  %v472_v8 = vld [vmem:[%s5292_s22 + $0x738] sm:$0xff]  ;;  %v479_v15 = vld [vmem:[%s5292_s22 + $0x770] sm:$0xff] }
 0x1b1   : > { %3771 = vmatprep.subr.bf16.mxu0 %v4401_v24  ;;  %3935 = vmatprep.subr.bf16.mxu1 %v4403_v25  ;;  %v4459_v24 = vcombine.high %v420_v18, %v424_v19  ;;  %v427_v25 = vld [vmem:[%s5292_s22 + $0x5d0] sm:$0xff]  ;;  %v476_v17 = vld [vmem:[%s5292_s22 + $0x758] sm:$0xff] }
 0x1b2   : > { %v4464_v37 = vcombine.low %v427_v25, %v431_v26 }
 0x1b4   : > { %3772 = vmatpush1.bf16.msra.mxu0 %v4400_v30  ;;  %3936 = vmatpush1.bf16.msra.mxu1 %v4402_v31  ;;  %v4458_v30 = vcombine.low %v420_v18, %v424_v19  ;;  %v4465_v31 = vcombine.high %v427_v25, %v431_v26  ;;  %v480_v18 = vld [vmem:[%s5292_s22 + $0x778] sm:$0xff]  ;;  %v487_v25 = vld [vmem:[%s5292_s22 + $0x7b0] sm:$0xff] }
 0x1b5   : > { %3782 = vmatprep.subr.bf16.mxu0 %v4409_v63  ;;  %3946 = vmatprep.subr.bf16.mxu1 %v4411_v33  ;;  %v4467_v63 = vcombine.high %v428_v27, %v432_v28  ;;  %v435_v33 = vld [vmem:[%s5292_s22 + $0x610] sm:$0xff]  ;;  %v484_v26 = vld [vmem:[%s5292_s22 + $0x798] sm:$0xff] }
 0x1b6   : > { %v4472_v9 = vcombine.low %v435_v33, %v439_v34 }
 0x1b7   : > { %3774 = vmatmul.mubr.bf16.vlgmr.msra.gmra.mrb[4].mxu0 %v5388_v23  ;;  %3938 = vmatmul.mubr.bf16.vlgmr.msra.gmra.mrb[4].mxu1 %v5388_v23  ;;  %v4424_v23 = vcombine.low %v387_v44, %v391_v45  ;;  %v447_v44 = vld [vmem:[%s5292_s22 + $0x670] sm:$0xff]  ;;  %v444_v45 = vld [vmem:[%s5292_s22 + $0x658] sm:$0xff] }
 0x1b8   : > { %3783 = vmatpush1.bf16.msra.mxu0 %v4408_v39  ;;  %3947 = vmatpush1.bf16.msra.mxu1 %v4410_v40  ;;  %v4466_v39 = vcombine.low %v428_v27, %v432_v28  ;;  %v4473_v40 = vcombine.high %v435_v33, %v439_v34  ;;  %v488_v27 = vld [vmem:[%s5292_s22 + $0x7b8] sm:$0xff]  ;;  %v495_v33 = vld [vmem:[%s5292_s22 + $0x7f0] sm:$0xff] }
 0x1b9   : > { %3784 = vmatprep.subr.bf16.mxu0 %v4417_v41  ;;  %3948 = vmatprep.subr.bf16.mxu1 %v4419_v42  ;;  %v4475_v41 = vcombine.high %v436_v35, %v440_v36  ;;  %v443_v42 = vld [vmem:[%s5292_s22 + $0x650] sm:$0xff]  ;;  %v492_v34 = vld [vmem:[%s5292_s22 + $0x7d8] sm:$0xff] }
 0x1ba   : > { %3814 = vmatprep.mubr.bf16.mxu0 %v5396_v32  ;;  %3978 = vmatprep.mubr.bf16.mxu1 %v5396_v32  ;;  %v4434_v32 = vcombine.low %v396_v55, %v400_v56  ;;  %v456_v55 = vld [vmem:[%s5292_s22 + $0x6b8] sm:$0xff]  ;;  %v4480_v56 = vcombine.low %v443_v42, %v447_v44 }
 0x1bc   : > { %3785 = vmatpush1.bf16.msra.mxu0 %v4416_v47  ;;  %3949 = vmatpush1.bf16.msra.mxu1 %v4418_v49  ;;  %v4474_v47 = vcombine.low %v436_v35, %v440_v36  ;;  %v4481_v49 = vcombine.high %v443_v42, %v447_v44  ;;  %v496_v35 = vld [vmem:[%s5292_s22 + $0x7f8] sm:$0xff]  ;;  %v503_v42 = vld [vmem:[%s5292_s22 + $0x830] sm:$0xff] }
 0x1bd   : > { %3786 = vmatprep.subr.bf16.mxu0 %v4425_v50  ;;  %3950 = vmatprep.subr.bf16.mxu1 %v4427_v51  ;;  %v4483_v50 = vcombine.high %v444_v45, %v448_v46  ;;  %v451_v51 = vld [vmem:[%s5292_s22 + $0x690] sm:$0xff]  ;;  %v500_v44 = vld [vmem:[%s5292_s22 + $0x818] sm:$0xff] }
 0x1be   : > { %v4488_v2 = vcombine.low %v451_v51, %v455_v52 }
 0x1c0   : > { %3787 = vmatpush1.bf16.msra.mxu0 %v4424_v23  ;;  %3951 = vmatpush1.bf16.msra.mxu1 %v4426_v57  ;;  %v4482_v23 = vcombine.low %v444_v45, %v448_v46  ;;  %v4489_v57 = vcombine.high %v451_v51, %v455_v52  ;;  %v504_v45 = vld [vmem:[%s5292_s22 + $0x838] sm:$0xff]  ;;  %v511_v51 = vld [vmem:[%s5292_s22 + $0x870] sm:$0xff] }
 0x1c1   : > { %3788 = vmatprep.subr.bf16.mxu0 %v4433_v60  ;;  %3952 = vmatprep.subr.bf16.mxu1 %v4435_v61  ;;  %v4491_v60 = vcombine.high %v452_v54, %v456_v55  ;;  %v459_v61 = vld [vmem:[%s5292_s22 + $0x6d0] sm:$0xff]  ;;  %v508_v52 = vld [vmem:[%s5292_s22 + $0x858] sm:$0xff] }
 0x1c2   : > { %v4496_v10 = vcombine.low %v459_v61, %v463_v62 }
 0x1c4   : > { %3789 = vmatpush1.bf16.msra.mxu0 %v4432_v3  ;;  %3953 = vmatpush1.bf16.msra.mxu1 %v4434_v32  ;;  %v4490_v3 = vcombine.low %v452_v54, %v456_v55  ;;  %v4497_v32 = vcombine.high %v459_v61, %v463_v62  ;;  %v512_v54 = vld [vmem:[%s5292_s22 + $0x878] sm:$0xff]  ;;  %v519_v61 = vld [vmem:[%s5292_s22 + $0x8b0] sm:$0xff] }
 0x1c5   : > { %3790 = vmatprep.subr.bf16.mxu0 %v4441_v4  ;;  %3954 = vmatprep.subr.bf16.mxu1 %v4443_v29  ;;  %v4499_v4 = vcombine.high %v460_v0, %v464_v1  ;;  %v467_v29 = vld [vmem:[%s5292_s22 + $0x710] sm:$0xff]  ;;  %v516_v62 = vld [vmem:[%s5292_s22 + $0x898] sm:$0xff] }
 0x1c6   : > { %v4504_v19 = vcombine.low %v467_v29, %v471_v6 }
 0x1c8   : > { %3791 = vmatpush1.bf16.msra.mxu0 %v4440_v11  ;;  %3955 = vmatpush1.bf16.msra.mxu1 %v4442_v12  ;;  %v4498_v11 = vcombine.low %v460_v0, %v464_v1  ;;  %v4505_v12 = vcombine.high %v467_v29, %v471_v6  ;;  %v520_v0 = vld [vmem:[%s5292_s22 + $0x8b8] sm:$0xff]  ;;  %v527_v29 = vld [vmem:[%s5292_s22 + $0x8f0] sm:$0xff] }
 0x1c9   : > { %3792 = vmatprep.subr.bf16.mxu0 %v4449_v13  ;;  %3956 = vmatprep.subr.bf16.mxu1 %v4451_v14  ;;  %v4507_v13 = vcombine.high %v468_v7, %v472_v8  ;;  %v475_v14 = vld [vmem:[%s5292_s22 + $0x750] sm:$0xff]  ;;  %v524_v6 = vld [vmem:[%s5292_s22 + $0x8d8] sm:$0xff] }
 0x1ca   : > { %v4512_v28 = vcombine.low %v475_v14, %v479_v15 }
 0x1cc   : > { %3793 = vmatpush1.bf16.msra.mxu0 %v4448_v20  ;;  %3957 = vmatpush1.bf16.msra.mxu1 %v4450_v21  ;;  %v4506_v20 = vcombine.low %v468_v7, %v472_v8  ;;  %v4513_v21 = vcombine.high %v475_v14, %v479_v15  ;;  %v528_v7 = vld [vmem:[%s5292_s22 + $0x8f8] sm:$0xff]  ;;  %v4554_v8 = vcombine.low %v516_v62, %v520_v0 }
 0x1cd   : > { %3794 = vmatprep.subr.bf16.mxu0 %v4457_v22  ;;  %3958 = vmatprep.subr.bf16.mxu1 %v4459_v24  ;;  %v4515_v22 = vcombine.high %v476_v17, %v480_v18  ;;  %v483_v24 = vld [vmem:[%s5292_s22 + $0x790] sm:$0xff]  ;;  %v532_v14 = vld [vmem:[%s5292_s22 + $0x918] sm:$0xff] }
 0x1ce   : > { %v4520_v36 = vcombine.low %v483_v24, %v487_v25  ;;  %v536_v15 = vld [vmem:[%s5292_s22 + $0x938] sm:$0xff] }
 0x1d0   : > { %3795 = vmatpush1.bf16.msra.mxu0 %v4456_v59  ;;  %3959 = vmatpush1.bf16.msra.mxu1 %v4458_v30  ;;  %v4514_v59 = vcombine.low %v476_v17, %v480_v18  ;;  %v4521_v30 = vcombine.high %v483_v24, %v487_v25  ;;  %v544_v24 = vld [vmem:[%s5292_s22 + $0x978] sm:$0xff] }
 0x1d1   : > { %3796 = vmatprep.subr.bf16.mxu0 %v4465_v31  ;;  %3960 = vmatprep.subr.bf16.mxu1 %v4467_v63  ;;  %v4523_v31 = vcombine.high %v484_v26, %v488_v27  ;;  %v491_v63 = vld [vmem:[%s5292_s22 + $0x7d0] sm:$0xff] }
 0x1d2   : > { %v4528_v46 = vcombine.low %v491_v63, %v495_v33 }
 0x1d4   : > { %3797 = vmatpush1.bf16.msra.mxu0 %v4464_v37  ;;  %3961 = vmatpush1.bf16.msra.mxu1 %v4466_v39  ;;  %v4522_v37 = vcombine.low %v484_v26, %v488_v27  ;;  %v4529_v39 = vcombine.high %v491_v63, %v495_v33  ;;  %v4570_v26 = vcombine.low %v532_v14, %v536_v15  ;;  %v552_v63 = vld [vmem:[%s5292_s22 + $0x9b8] sm:$0xff] }
 0x1d5   : > { %3798 = vmatprep.subr.bf16.mxu0 %v4473_v40  ;;  %3962 = vmatprep.subr.bf16.mxu1 %v4475_v41  ;;  %v4531_v40 = vcombine.high %v492_v34, %v496_v35  ;;  %v499_v41 = vld [vmem:[%s5292_s22 + $0x810] sm:$0xff] }
 0x1d6   : > { %v4536_v55 = vcombine.low %v499_v41, %v503_v42 }
 0x1d8   : > { %3799 = vmatpush1.bf16.msra.mxu0 %v4472_v9  ;;  %3963 = vmatpush1.bf16.msra.mxu1 %v4474_v47  ;;  %v4530_v9 = vcombine.low %v492_v34, %v496_v35  ;;  %v4537_v47 = vcombine.high %v499_v41, %v503_v42  ;;  %v560_v41 = vld [vmem:[%s5292_s22 + $0x9f8] sm:$0xff] }
 0x1d9   : > { %3800 = vmatprep.subr.bf16.mxu0 %v4481_v49  ;;  %3964 = vmatprep.subr.bf16.mxu1 %v4483_v50  ;;  %v4539_v49 = vcombine.high %v500_v44, %v504_v45  ;;  %v507_v50 = vld [vmem:[%s5292_s22 + $0x850] sm:$0xff] }
 0x1da   : > { %v4544_v1 = vcombine.low %v507_v50, %v511_v51 }
 0x1dc   : > { %3801 = vmatpush1.bf16.msra.mxu0 %v4480_v56  ;;  %3965 = vmatpush1.bf16.msra.mxu1 %v4482_v23  ;;  %v4538_v56 = vcombine.low %v500_v44, %v504_v45  ;;  %v4545_v23 = vcombine.high %v507_v50, %v511_v51  ;;  %v568_v50 = vld [vmem:[%s5292_s22 + $0xa38] sm:$0xff] }
 0x1dd   : > { %3802 = vmatprep.subr.bf16.mxu0 %v4489_v57  ;;  %3966 = vmatprep.subr.bf16.mxu1 %v4491_v60  ;;  %v4547_v57 = vcombine.high %v508_v52, %v512_v54  ;;  %v515_v60 = vld [vmem:[%s5292_s22 + $0x890] sm:$0xff] }
 0x1e0   : > { %3803 = vmatpush1.bf16.msra.mxu0 %v4488_v2  ;;  %3967 = vmatpush1.bf16.msra.mxu1 %v4490_v3  ;;  %v4546_v2 = vcombine.low %v508_v52, %v512_v54  ;;  %v4553_v3 = vcombine.high %v515_v60, %v519_v61 }
 0x1e1   : > { %3804 = vmatprep.subr.bf16.mxu0 %v4497_v32  ;;  %3968 = vmatprep.subr.bf16.mxu1 %v4499_v4  ;;  %v4555_v32 = vcombine.high %v516_v62, %v520_v0  ;;  %v523_v4 = vld [vmem:[%s5292_s22 + $0x8d0] sm:$0xff] }
 0x1e2   : > { %v4560_v17 = vcombine.low %v523_v4, %v527_v29 }
 0x1e4   : > { %3805 = vmatpush1.bf16.msra.mxu0 %v4496_v10  ;;  %3969 = vmatpush1.bf16.msra.mxu1 %v4498_v11  ;;  %v4561_v10 = vcombine.high %v523_v4, %v527_v29  ;;  %v4563_v11 = vcombine.high %v524_v6, %v528_v7  ;;  %v584_v4 = vld [vmem:[%s5292_s22 + $0xab8] sm:$0xff] }
 0x1e5   : > { %3806 = vmatprep.subr.bf16.mxu0 %v4505_v12  ;;  %3970 = vmatprep.subr.bf16.mxu1 %v4507_v13  ;;  %v531_v12 = vld [vmem:[%s5292_s22 + $0x910] sm:$0xff] }
 0x1e6   : > { %v535_v13 = vld [vmem:[%s5292_s22 + $0x930] sm:$0xff] }
 0x1e7   : > { %v4569_v18 = vcombine.high %v531_v12, %v535_v13  ;;  %v4568_v25 = vcombine.low %v531_v12, %v535_v13  ;;  %v592_v12 = vld [vmem:[%s5292_s22 + $0xaf8] sm:$0xff] }
 0x1e8   : > { %3807 = vmatpush1.bf16.msra.mxu0 %v4504_v19  ;;  %3971 = vmatpush1.bf16.msra.mxu1 %v4506_v20  ;;  %v4571_v19 = vcombine.high %v532_v14, %v536_v15  ;;  %v539_v20 = vld [vmem:[%s5292_s22 + $0x950] sm:$0xff] }
 0x1e9   : > { %3808 = vmatprep.subr.bf16.mxu0 %v4513_v21  ;;  %3972 = vmatprep.subr.bf16.mxu1 %v4515_v22  ;;  %v543_v21 = vld [vmem:[%s5292_s22 + $0x970] sm:$0xff]  ;;  %v540_v22 = vld [vmem:[%s5292_s22 + $0x958] sm:$0xff] }
 0x1ea   : > { %v4577_v27 = vcombine.high %v539_v20, %v543_v21  ;;  %v4576_v33 = vcombine.low %v539_v20, %v543_v21  ;;  %v4578_v34 = vcombine.low %v540_v22, %v544_v24  ;;  %v600_v20 = vld [vmem:[%s5292_s22 + $0xb38] sm:$0xff] }
 0x1ec   : > { %3809 = vmatpush1.bf16.msra.mxu0 %v4512_v28  ;;  %3973 = vmatpush1.bf16.msra.mxu1 %v4514_v59  ;;  %v4579_v28 = vcombine.high %v540_v22, %v544_v24  ;;  %v547_v59 = vld [vmem:[%s5292_s22 + $0x990] sm:$0xff] }
 0x1ed   : > { %3810 = vmatprep.subr.bf16.mxu0 %v4521_v30  ;;  %3974 = vmatprep.subr.bf16.mxu1 %v4523_v31  ;;  %v551_v30 = vld [vmem:[%s5292_s22 + $0x9b0] sm:$0xff]  ;;  %v548_v31 = vld [vmem:[%s5292_s22 + $0x998] sm:$0xff] }
 0x1ee   : > { %v4585_v35 = vcombine.high %v547_v59, %v551_v30  ;;  %v4584_v42 = vcombine.low %v547_v59, %v551_v30  ;;  %v4586_v44 = vcombine.low %v548_v31, %v552_v63  ;;  %v608_v59 = vld [vmem:[%s5292_s22 + $0xb78] sm:$0xff] }
 0x1f0   : > { %3811 = vmatpush1.bf16.msra.mxu0 %v4520_v36  ;;  %3975 = vmatpush1.bf16.msra.mxu1 %v4522_v37  ;;  %v4587_v36 = vcombine.high %v548_v31, %v552_v63  ;;  %v555_v37 = vld [vmem:[%s5292_s22 + $0x9d0] sm:$0xff] }
 0x1f1   : > { %3812 = vmatprep.subr.bf16.mxu0 %v4529_v39  ;;  %3976 = vmatprep.subr.bf16.mxu1 %v4531_v40  ;;  %v559_v39 = vld [vmem:[%s5292_s22 + $0x9f0] sm:$0xff]  ;;  %v556_v40 = vld [vmem:[%s5292_s22 + $0x9d8] sm:$0xff] }
 0x1f2   : > { %v4593_v45 = vcombine.high %v555_v37, %v559_v39  ;;  %v4592_v51 = vcombine.low %v555_v37, %v559_v39  ;;  %v4594_v52 = vcombine.low %v556_v40, %v560_v41  ;;  %v616_v37 = vld [vmem:[%s5292_s22 + $0xbb8] sm:$0xff] }
 0x1f4   : > { %3813 = vmatpush1.bf16.msra.mxu0 %v4528_v46  ;;  %3977 = vmatpush1.bf16.msra.mxu1 %v4530_v9  ;;  %v4595_v46 = vcombine.high %v556_v40, %v560_v41  ;;  %v563_v9 = vld [vmem:[%s5292_s22 + $0xa10] sm:$0xff] }
 0x1f5   : > { %3823 = vmatprep.subr.bf16.mxu0 %v4537_v47  ;;  %3987 = vmatprep.subr.bf16.mxu1 %v4539_v49  ;;  %v567_v47 = vld [vmem:[%s5292_s22 + $0xa30] sm:$0xff]  ;;  %v564_v49 = vld [vmem:[%s5292_s22 + $0xa18] sm:$0xff] }
 0x1f6   : > { %v4601_v54 = vcombine.high %v563_v9, %v567_v47  ;;  %v4602_v62 = vcombine.low %v564_v49, %v568_v50 }
 0x1f7   : > { %3815 = vmatmul.mubr.bf16.vlgmr.msra.gmra.mrb[4].mxu0 %v5471_v38  ;;  %3979 = vmatmul.mubr.bf16.vlgmr.msra.gmra.mrb[4].mxu1 %v5471_v38  ;;  %v4552_v38 = vcombine.low %v515_v60, %v519_v61  ;;  %v576_v60 = vld [vmem:[%s5292_s22 + $0xa78] sm:$0xff]  ;;  %v4600_v61 = vcombine.low %v563_v9, %v567_v47 }
 0x1f8   : > { %3824 = vmatpush1.bf16.msra.mxu0 %v4536_v55  ;;  %3988 = vmatpush1.bf16.msra.mxu1 %v4538_v56  ;;  %v4603_v55 = vcombine.high %v564_v49, %v568_v50  ;;  %v571_v56 = vld [vmem:[%s5292_s22 + $0xa50] sm:$0xff]  ;;  %v624_v9 = vld [vmem:[%s5292_s22 + $0xbf8] sm:$0xff] }
 0x1f9   : > { %3825 = vmatprep.subr.bf16.mxu0 %v4545_v23  ;;  %3989 = vmatprep.subr.bf16.mxu1 %v4547_v57  ;;  %v575_v23 = vld [vmem:[%s5292_s22 + $0xa70] sm:$0xff]  ;;  %v572_v57 = vld [vmem:[%s5292_s22 + $0xa58] sm:$0xff] }
 0x1fa   : > { %3855 = vmatprep.mubr.bf16.mxu0 %v5478_v48  ;;  %4019 = vmatprep.mubr.bf16.mxu1 %v5478_v48  ;;  %v4562_v48 = vcombine.low %v524_v6, %v528_v7  ;;  %v4609_v0 = vcombine.high %v571_v56, %v575_v23  ;;  %v4608_v29 = vcombine.low %v571_v56, %v575_v23  ;;  %v632_v56 = vld [vmem:[%s5292_s22 + $0xc38] sm:$0xff] }
 0x1fb   : > { %v4610_v6 = vcombine.low %v572_v57, %v576_v60 }
 0x1fc   : > { %3826 = vmatpush1.bf16.msra.mxu0 %v4544_v1  ;;  %3990 = vmatpush1.bf16.msra.mxu1 %v4546_v2  ;;  %v4611_v1 = vcombine.high %v572_v57, %v576_v60  ;;  %v579_v2 = vld [vmem:[%s5292_s22 + $0xa90] sm:$0xff] }
 0x1fd   : > { %3827 = vmatprep.subr.bf16.mxu0 %v4553_v3  ;;  %3991 = vmatprep.subr.bf16.mxu1 %v4555_v32  ;;  %v583_v3 = vld [vmem:[%s5292_s22 + $0xab0] sm:$0xff]  ;;  %v580_v32 = vld [vmem:[%s5292_s22 + $0xa98] sm:$0xff] }
 0x1fe   : > { %v4617_v7 = vcombine.high %v579_v2, %v583_v3  ;;  %v4616_v13 = vcombine.low %v579_v2, %v583_v3  ;;  %v4618_v14 = vcombine.low %v580_v32, %v584_v4  ;;  %v640_v2 = vld [vmem:[%s5292_s22 + $0xc78] sm:$0xff] }
 0x200   : > { %3828 = vmatpush1.bf16.msra.mxu0 %v4552_v38  ;;  %3992 = vmatpush1.bf16.msra.mxu1 %v4554_v8  ;;  %v4619_v38 = vcombine.high %v580_v32, %v584_v4  ;;  %v587_v8 = vld [vmem:[%s5292_s22 + $0xad0] sm:$0xff] }
 0x201   : > { %3829 = vmatprep.subr.bf16.mxu0 %v4561_v10  ;;  %3993 = vmatprep.subr.bf16.mxu1 %v4563_v11  ;;  %v591_v10 = vld [vmem:[%s5292_s22 + $0xaf0] sm:$0xff]  ;;  %v588_v11 = vld [vmem:[%s5292_s22 + $0xad8] sm:$0xff] }
 0x202   : > { %v4625_v15 = vcombine.high %v587_v8, %v591_v10  ;;  %v4624_v21 = vcombine.low %v587_v8, %v591_v10  ;;  %v4626_v22 = vcombine.low %v588_v11, %v592_v12  ;;  %v648_v8 = vld [vmem:[%s5292_s22 + $0xcb8] sm:$0xff] }
 0x204   : > { %3830 = vmatpush1.bf16.msra.mxu0 %v4560_v17  ;;  %3994 = vmatpush1.bf16.msra.mxu1 %v4562_v48  ;;  %v4627_v17 = vcombine.high %v588_v11, %v592_v12  ;;  %v595_v48 = vld [vmem:[%s5292_s22 + $0xb10] sm:$0xff] }
 0x205   : > { %3831 = vmatprep.subr.bf16.mxu0 %v4569_v18  ;;  %3995 = vmatprep.subr.bf16.mxu1 %v4571_v19  ;;  %v599_v18 = vld [vmem:[%s5292_s22 + $0xb30] sm:$0xff]  ;;  %v596_v19 = vld [vmem:[%s5292_s22 + $0xb18] sm:$0xff] }
 0x206   : > { %v4633_v24 = vcombine.high %v595_v48, %v599_v18  ;;  %v4632_v30 = vcombine.low %v595_v48, %v599_v18  ;;  %v4634_v31 = vcombine.low %v596_v19, %v600_v20  ;;  %v656_v48 = vld [vmem:[%s5292_s22 + $0xcf8] sm:$0xff] }
 0x208   : > { %3832 = vmatpush1.bf16.msra.mxu0 %v4568_v25  ;;  %3996 = vmatpush1.bf16.msra.mxu1 %v4570_v26  ;;  %v4635_v25 = vcombine.high %v596_v19, %v600_v20  ;;  %v603_v26 = vld [vmem:[%s5292_s22 + $0xb50] sm:$0xff] }
 0x209   : > { %3833 = vmatprep.subr.bf16.mxu0 %v4577_v27  ;;  %3997 = vmatprep.subr.bf16.mxu1 %v4579_v28  ;;  %v607_v27 = vld [vmem:[%s5292_s22 + $0xb70] sm:$0xff]  ;;  %v604_v28 = vld [vmem:[%s5292_s22 + $0xb58] sm:$0xff] }
 0x20a   : > { %v4641_v63 = vcombine.high %v603_v26, %v607_v27  ;;  %v4640_v39 = vcombine.low %v603_v26, %v607_v27  ;;  %v4642_v40 = vcombine.low %v604_v28, %v608_v59 }
 0x20c   : > { %3834 = vmatpush1.bf16.msra.mxu0 %v4576_v33  ;;  %3998 = vmatpush1.bf16.msra.mxu1 %v4578_v34  ;;  %v4643_v33 = vcombine.high %v604_v28, %v608_v59  ;;  %v611_v34 = vld [vmem:[%s5292_s22 + $0xb90] sm:$0xff] }
 0x20d   : > { %3835 = vmatprep.subr.bf16.mxu0 %v4585_v35  ;;  %3999 = vmatprep.subr.bf16.mxu1 %v4587_v36  ;;  %v615_v35 = vld [vmem:[%s5292_s22 + $0xbb0] sm:$0xff]  ;;  %v612_v36 = vld [vmem:[%s5292_s22 + $0xb98] sm:$0xff] }
 0x20e   : > { %v4649_v41 = vcombine.high %v611_v34, %v615_v35  ;;  %v4648_v47 = vcombine.low %v611_v34, %v615_v35  ;;  %v4650_v49 = vcombine.low %v612_v36, %v616_v37  ;;  %v667_v59 = vld [vmem:[%s5292_s22 + $0xd50] sm:$0xff]  ;;  %v5854_v35 = vld [vmem:[%s209_s27] sm:$0xff] }
 0x210   : > { %3836 = vmatpush1.bf16.msra.mxu0 %v4584_v42  ;;  %4000 = vmatpush1.bf16.msra.mxu1 %v4586_v44  ;;  %v4651_v42 = vcombine.high %v612_v36, %v616_v37  ;;  %v619_v44 = vld [vmem:[%s5292_s22 + $0xbd0] sm:$0xff]  ;;  %v765_v36 = vsub.s32 2, %v5320_v43  ;;  %v761_v37 = vsub.s32 1, %v5320_v43 }
 0x211   : > { %3837 = vmatprep.subr.bf16.mxu0 %v4593_v45  ;;  %4001 = vmatprep.subr.bf16.mxu1 %v4595_v46  ;;  %v623_v45 = vld [vmem:[%s5292_s22 + $0xbf0] sm:$0xff]  ;;  %v620_v46 = vld [vmem:[%s5292_s22 + $0xbd8] sm:$0xff] }
 0x212   : > { %v4657_v50 = vcombine.high %v619_v44, %v623_v45  ;;  %v4656_v23 = vcombine.low %v619_v44, %v623_v45  ;;  %v4658_v57 = vcombine.low %v620_v46, %v624_v9  ;;  %v675_v44 = vld [vmem:[%s5292_s22 + $0xd90] sm:$0xff] }
 0x213   : > { %v679_v45 = vld [vmem:[%s5292_s22 + $0xdb0] sm:$0xff] }
 0x214   : > { %3838 = vmatpush1.bf16.msra.mxu0 %v4592_v51  ;;  %4002 = vmatpush1.bf16.msra.mxu1 %v4594_v52  ;;  %v4659_v51 = vcombine.high %v620_v46, %v624_v9  ;;  %v627_v52 = vld [vmem:[%s5292_s22 + $0xc10] sm:$0xff]  ;;  %v676_v9 = vld [vmem:[%s5292_s22 + $0xd98] sm:$0xff] }
 0x215   : > { %3839 = vmatprep.subr.bf16.mxu0 %v4601_v54  ;;  %4003 = vmatprep.subr.bf16.mxu1 %v4603_v55  ;;  %v631_v54 = vld [vmem:[%s5292_s22 + $0xc30] sm:$0xff]  ;;  %v628_v55 = vld [vmem:[%s5292_s22 + $0xc18] sm:$0xff] }
 0x216   : > { %v4665_v60 = vcombine.high %v627_v52, %v631_v54  ;;  %v4664_v3 = vcombine.low %v627_v52, %v631_v54  ;;  %v4666_v32 = vcombine.low %v628_v55, %v632_v56 }
 0x218   : > { %3840 = vmatpush1.bf16.msra.mxu0 %v4600_v61  ;;  %4004 = vmatpush1.bf16.msra.mxu1 %v4602_v62  ;;  %v4667_v61 = vcombine.high %v628_v55, %v632_v56  ;;  %v635_v62 = vld [vmem:[%s5292_s22 + $0xc50] sm:$0xff]  ;;  %v4713_v55 = vcombine.high %v675_v44, %v679_v45 }
 0x219   : > { %3841 = vmatprep.subr.bf16.mxu0 %v4609_v0  ;;  %4005 = vmatprep.subr.bf16.mxu1 %v4611_v1  ;;  %v639_v0 = vld [vmem:[%s5292_s22 + $0xc70] sm:$0xff]  ;;  %v636_v1 = vld [vmem:[%s5292_s22 + $0xc58] sm:$0xff] }
 0x21a   : > { %v4673_v4 = vcombine.high %v635_v62, %v639_v0  ;;  %v4672_v10 = vcombine.low %v635_v62, %v639_v0  ;;  %v4674_v11 = vcombine.low %v636_v1, %v640_v2 }
 0x21c   : > { %3842 = vmatpush1.bf16.msra.mxu0 %v4608_v29  ;;  %4006 = vmatpush1.bf16.msra.mxu1 %v4610_v6  ;;  %v4675_v29 = vcombine.high %v636_v1, %v640_v2  ;;  %v643_v6 = vld [vmem:[%s5292_s22 + $0xc90] sm:$0xff]  ;;  %v684_v1 = vld [vmem:[%s5292_s22 + $0xdd8] sm:$0xff] }
 0x21d   : > { %3843 = vmatprep.subr.bf16.mxu0 %v4617_v7  ;;  %4007 = vmatprep.subr.bf16.mxu1 %v4619_v38  ;;  %v647_v7 = vld [vmem:[%s5292_s22 + $0xcb0] sm:$0xff]  ;;  %v644_v38 = vld [vmem:[%s5292_s22 + $0xc98] sm:$0xff] }
 0x21e   : > { %v4681_v12 = vcombine.high %v643_v6, %v647_v7  ;;  %v4682_v18 = vcombine.low %v644_v38, %v648_v8  ;;  %v688_v2 = vld [vmem:[%s5292_s22 + $0xdf8] sm:$0xff] }
 0x220   : > { %3844 = vmatpush1.bf16.msra.mxu0 %v4616_v13  ;;  %4008 = vmatpush1.bf16.msra.mxu1 %v4618_v14  ;;  %v4683_v13 = vcombine.high %v644_v38, %v648_v8  ;;  %v651_v14 = vld [vmem:[%s5292_s22 + $0xcd0] sm:$0xff] }
 0x221   : > { %3845 = vmatprep.subr.bf16.mxu0 %v4625_v15  ;;  %4009 = vmatprep.subr.bf16.mxu1 %v4627_v17  ;;  %v655_v15 = vld [vmem:[%s5292_s22 + $0xcf0] sm:$0xff]  ;;  %v652_v17 = vld [vmem:[%s5292_s22 + $0xcd8] sm:$0xff] }
 0x222   : > { %v4689_v19 = vcombine.high %v651_v14, %v655_v15  ;;  %v4691_v20 = vcombine.high %v652_v17, %v656_v48  ;;  %v4690_v26 = vcombine.low %v652_v17, %v656_v48  ;;  %v4723_v17 = vcombine.high %v684_v1, %v688_v2  ;;  %v691_v48 = vld [vmem:[%s5292_s22 + $0xe10] sm:$0xff] }
 0x224   : > { %3846 = vmatpush1.bf16.msra.mxu0 %v4624_v21  ;;  %4010 = vmatpush1.bf16.msra.mxu1 %v4626_v22  ;;  %v659_v21 = vld [vmem:[%s5292_s22 + $0xd10] sm:$0xff] }
 0x225   : > { %3847 = vmatprep.subr.bf16.mxu0 %v4633_v24  ;;  %4011 = vmatprep.subr.bf16.mxu1 %v4635_v25  ;;  %v663_v22 = vld [vmem:[%s5292_s22 + $0xd30] sm:$0xff]  ;;  %v660_v24 = vld [vmem:[%s5292_s22 + $0xd18] sm:$0xff] }
 0x226   : > { %v664_v25 = vld [vmem:[%s5292_s22 + $0xd38] sm:$0xff]  ;;  %v4697_v27 = vcombine.high %v659_v21, %v663_v22  ;;  %v4696_v34 = vcombine.low %v659_v21, %v663_v22 }
 0x227   : > { %v4699_v28 = vcombine.high %v660_v24, %v664_v25 }
 0x228   : > { %3848 = vmatpush1.bf16.msra.mxu0 %v4632_v30  ;;  %4012 = vmatpush1.bf16.msra.mxu1 %v4634_v31  ;;  %v671_v30 = vld [vmem:[%s5292_s22 + $0xd70] sm:$0xff]  ;;  %v757_v31 = vsub.s32 0, %v5320_v43 }
 0x229   : > { %3849 = vmatprep.subr.bf16.mxu0 %v4641_v63  ;;  %4013 = vmatprep.subr.bf16.mxu1 %v4643_v33  ;;  %v668_v63 = vld [vmem:[%s5292_s22 + $0xd58] sm:$0xff] }
 0x22a   : > { %v672_v33 = vld [vmem:[%s5292_s22 + $0xd78] sm:$0xff]  ;;  %v758_v46 = vrot.slane %v5854_v35, %v757_v31 }
 0x22b   : > { %v4706_v54 = vcombine.low %v668_v63, %v672_v33  ;;  %v700_v31 = vld [vmem:[%s5292_s22 + $0xe58] sm:$0xff] }
 0x22c   : > { %3850 = vmatpush1.bf16.msra.mxu0 %v4640_v39  ;;  %4014 = vmatpush1.bf16.msra.mxu1 %v4642_v40  ;;  %v4698_v39 = vcombine.low %v660_v24, %v664_v25  ;;  %v769_v40 = vsub.s32 3, %v5320_v43  ;;  %v4722_v25 = vcombine.low %v684_v1, %v688_v2 }
 0x22d   : > { %3851 = vmatprep.subr.bf16.mxu0 %v4649_v41  ;;  %4015 = vmatprep.subr.bf16.mxu1 %v4651_v42  ;;  %v4705_v41 = vcombine.high %v667_v59, %v671_v30  ;;  %v4707_v42 = vcombine.high %v668_v63, %v672_v33  ;;  %v704_v63 = vld [vmem:[%s5292_s22 + $0xe78] sm:$0xff] }
 0x22e   : > { %v770_v52 = vrot.slane %v5854_v35, %v769_v40  ;;  %v707_v40 = vld [vmem:[%s5292_s22 + $0xe90] sm:$0xff] }
 0x230   : > { %3852 = vmatpush1.bf16.msra.mxu0 %v4648_v47  ;;  %4016 = vmatpush1.bf16.msra.mxu1 %v4650_v49  ;;  %v680_v47 = vld [vmem:[%s5292_s22 + $0xdb8] sm:$0xff]  ;;  %v766_v49 = vrot.slane %v5854_v35, %v765_v36 }
 0x231   : > { %3853 = vmatprep.subr.bf16.mxu0 %v4657_v50  ;;  %4017 = vmatprep.subr.bf16.mxu1 %v4659_v51  ;;  %v762_v50 = vrot.slane %v5854_v35, %v761_v37  ;;  %v4704_v51 = vcombine.low %v667_v59, %v671_v30  ;;  %v703_v59 = vld [vmem:[%s5292_s22 + $0xe70] sm:$0xff] }
 0x234   : > { %3854 = vmatpush1.bf16.msra.mxu0 %v4656_v23  ;;  %4018 = vmatpush1.bf16.msra.mxu1 %v4658_v57  ;;  %v4715_v23 = vcombine.high %v676_v9, %v680_v47  ;;  %v683_v57 = vld [vmem:[%s5292_s22 + $0xdd0] sm:$0xff] }
 0x235   : > { %3864 = vmatprep.subr.bf16.mxu0 %v4665_v60  ;;  %4028 = vmatprep.subr.bf16.mxu1 %v4667_v61  ;;  %v687_v60 = vld [vmem:[%s5292_s22 + $0xdf0] sm:$0xff] }
 0x236   : > { %v4720_v22 = vcombine.low %v683_v57, %v687_v60 }
 0x237   : > { %3856 = vmatmul.mubr.bf16.vlgmr.msra.gmra.mrb[4].mxu0 %v5546_v58  ;;  %4020 = vmatmul.mubr.bf16.vlgmr.msra.gmra.mrb[4].mxu1 %v5546_v58  ;;  %v4680_v58 = vcombine.low %v643_v6, %v647_v7  ;;  %v4712_v6 = vcombine.low %v675_v44, %v679_v45  ;;  %v712_v44 = vld [vmem:[%s5292_s22 + $0xeb8] sm:$0xff] }
 0x238   : > { %3865 = vmatpush1.bf16.msra.mxu0 %v4664_v3  ;;  %4029 = vmatpush1.bf16.msra.mxu1 %v4666_v32 }
 0x239   : > { %3866 = vmatprep.subr.bf16.mxu0 %v4673_v4  ;;  %4030 = vmatprep.subr.bf16.mxu1 %v4675_v29 }
 0x23a   : > { %3896 = vmatprep.mubr.bf16.mxu0 %v5554_v5  ;;  %4060 = vmatprep.mubr.bf16.mxu1 %v5554_v5  ;;  %v4688_v5 = vcombine.low %v651_v14, %v655_v15 }
 0x23c   : > { %3867 = vmatpush1.bf16.msra.mxu0 %v4672_v10  ;;  %4031 = vmatpush1.bf16.msra.mxu1 %v4674_v11  ;;  %v4714_v11 = vcombine.low %v676_v9, %v680_v47 }
 0x23d   : > { %3868 = vmatprep.subr.bf16.mxu0 %v4681_v12  ;;  %4032 = vmatprep.subr.bf16.mxu1 %v4683_v13  ;;  %v4721_v12 = vcombine.high %v683_v57, %v687_v60  ;;  %v723_v57 = vld [vmem:[%s5292_s22 + $0xf10] sm:$0xff] }
 0x23e   : > { %v727_v60 = vld [vmem:[%s5292_s22 + $0xf30] sm:$0xff] }
 0x23f   : > { %v4761_v2 = vcombine.high %v723_v57, %v727_v60 }
 0x240   : > { %3869 = vmatpush1.bf16.msra.mxu0 %v4680_v58  ;;  %4033 = vmatpush1.bf16.msra.mxu1 %v4682_v18  ;;  %v695_v58 = vld [vmem:[%s5292_s22 + $0xe30] sm:$0xff] }
 0x241   : > { %3870 = vmatprep.subr.bf16.mxu0 %v4689_v19  ;;  %4034 = vmatprep.subr.bf16.mxu1 %v4691_v20  ;;  %v692_v19 = vld [vmem:[%s5292_s22 + $0xe18] sm:$0xff]  ;;  %v4728_v33 = vcombine.low %v691_v48, %v695_v58 }
 0x242   : > { %v696_v20 = vld [vmem:[%s5292_s22 + $0xe38] sm:$0xff] }
 0x243   : > { %v4730_v36 = vcombine.low %v692_v19, %v696_v20 }
 0x244   : > { %3871 = vmatpush1.bf16.msra.mxu0 %v4688_v5  ;;  %4035 = vmatpush1.bf16.msra.mxu1 %v4690_v26  ;;  %v4729_v5 = vcombine.high %v691_v48, %v695_v58 }
 0x245   : > { %3872 = vmatprep.subr.bf16.mxu0 %v4697_v27  ;;  %4036 = vmatprep.subr.bf16.mxu1 %v4699_v28  ;;  %v4731_v27 = vcombine.high %v692_v19, %v696_v20  ;;  %v699_v28 = vld [vmem:[%s5292_s22 + $0xe50] sm:$0xff]  ;;  %v748_v20 = vld [vmem:[%s5292_s22 + $0xfd8] sm:$0xff] }
 0x246   : > { %v4737_v37 = vcombine.high %v699_v28, %v703_v59  ;;  %v4736_v45 = vcombine.low %v699_v28, %v703_v59  ;;  %v751_v19 = vld [vmem:[%s5292_s22 + $0xff0] sm:$0xff]  ;;  %v773_v28 = vsub.s32 4, %v5320_v43  ;;  %v781_v59 = vsub.s32 6, %v5320_v43 }
 0x248   : > { %3873 = vmatpush1.bf16.msra.mxu0 %v4696_v34  ;;  %4037 = vmatpush1.bf16.msra.mxu1 %v4698_v39  ;;  %v4739_v39 = vcombine.high %v700_v31, %v704_v63 }
 0x249   : > { %3874 = vmatprep.subr.bf16.mxu0 %v4705_v41  ;;  %4038 = vmatprep.subr.bf16.mxu1 %v4707_v42  ;;  %v711_v41 = vld [vmem:[%s5292_s22 + $0xeb0] sm:$0xff]  ;;  %v708_v42 = vld [vmem:[%s5292_s22 + $0xe98] sm:$0xff] }
 0x24a   : > { %v3570_v56 = vpop.f32.mrb[0].mxu0  ;;  %v3734_v62 = vpop.f32.mrb[0].mxu1  ;;  %v4745_v9 = vcombine.high %v707_v40, %v711_v41  ;;  %v4747_v47 = vcombine.high %v708_v42, %v712_v44 }
 0x24b   : > { %v4800_v61 = vadd.f32 %v3570_v56, %v758_v46  ;;  %v3572_v0 = vpop.f32.mrb[1].mxu0  ;;  %v4802_v3 = vadd.f32 %v3734_v62, %v766_v49  ;;  %v3736_v4 = vpop.f32.mrb[1].mxu1  ;;  %v4738_v46 = vcombine.low %v700_v31, %v704_v63  ;;  %v715_v49 = vld [vmem:[%s5292_s22 + $0xed0] sm:$0xff]  ;;  %v728_v62 = vld [vmem:[%s5292_s22 + $0xf38] sm:$0xff]  ;;  %v785_v31 = vsub.s32 7, %v5320_v43 }
 0x24c   : > { %v4801_v32 = vadd.f32 %v3572_v0, %v762_v50  ;;  %v3574_v29 = vpop.f32.mrb[2].mxu0  ;;  %3875 = vmatpush1.bf16.msra.mxu0 %v4704_v51  ;;  %v4803_v38 = vadd.f32 %v3736_v4, %v770_v52  ;;  %v3738_v8 = vpop.f32.mrb[2].mxu1  ;;  %4039 = vmatpush1.bf16.msra.mxu1 %v4706_v54  ;;  %v719_v50 = vld [vmem:[%s5292_s22 + $0xef0] sm:$0xff]  ;;  %v716_v51 = vld [vmem:[%s5292_s22 + $0xed8] sm:$0xff]  ;;  %v4744_v54 = vcombine.low %v707_v40, %v711_v41 }
 0x24d   : > { %v4069_v7 = vmax.f32 %v4800_v61, 0.0  ;;  %v3575_v10 = vpop.f32.mrb[3].mxu0  ;;  %3876 = vmatprep.subr.bf16.mxu0 %v4713_v55  ;;  %v4071_v13 = vmax.f32 %v4802_v3, 0.0  ;;  %v3739_v15 = vpop.f32.mrb[3].mxu1  ;;  %4040 = vmatprep.subr.bf16.mxu1 %v4715_v23  ;;  %v720_v52 = vld [vmem:[%s5292_s22 + $0xef8] sm:$0xff]  ;;  %v4746_v55 = vcombine.low %v708_v42, %v712_v44  ;;  %v4753_v56 = vcombine.high %v715_v49, %v719_v50  ;;  %v735_v4 = vld [vmem:[%s5292_s22 + $0xf70] sm:$0xff] }
 0x24e   : > { %v4070_v14 = vmax.f32 %v4801_v32, 0.0  ;;  %v4072_v18 = vmax.f32 %v4803_v38, 0.0  ;;  %v4755_v23 = vcombine.high %v716_v51, %v720_v52  ;;  %v724_v61 = vld [vmem:[%s5292_s22 + $0xf18] sm:$0xff]  ;;  %v4752_v0 = vcombine.low %v715_v49, %v719_v50  ;;  %v731_v32 = vld [vmem:[%s5292_s22 + $0xf50] sm:$0xff] }
 0x24f   : > { %v4754_v1 = vcombine.low %v716_v51, %v720_v52  ;;  %v4763_v3 = vcombine.high %v724_v61, %v728_v62  ;;  %v732_v29 = vld [vmem:[%s5292_s22 + $0xf58] sm:$0xff]  ;;  %v4762_v38 = vcombine.low %v724_v61, %v728_v62  ;;  %v4769_v8 = vcombine.high %v731_v32, %v735_v4 }
 0x250   : > { %v4788_v21 = vpack.c.bf16 %v4070_v14, %v4069_v7  ;;  %3877 = vmatpush1.bf16.msra.mxu0 %v4712_v6  ;;  %v4789_v24 = vpack.c.bf16 %v4072_v18, %v4071_v13  ;;  %4041 = vmatpush1.bf16.msra.mxu1 %v4714_v11  ;;  %v736_v6 = vld [vmem:[%s5292_s22 + $0xf78] sm:$0xff]  ;;  %v4760_v7 = vcombine.low %v723_v57, %v727_v60  ;;  %v739_v11 = vld [vmem:[%s5292_s22 + $0xf90] sm:$0xff] }
 0x251   : > { %3878 = vmatprep.subr.bf16.mxu0 %v4721_v12  ;;  %4042 = vmatprep.subr.bf16.mxu1 %v4723_v17  ;;  %v4771_v10 = vcombine.high %v732_v29, %v736_v6  ;;  %v743_v12 = vld [vmem:[%s5292_s22 + $0xfb0] sm:$0xff]  ;;  %v740_v13 = vld [vmem:[%s5292_s22 + $0xf98] sm:$0xff]  ;;  %v4768_v15 = vcombine.low %v731_v32, %v735_v4  ;;  %v4770_v17 = vcombine.low %v732_v29, %v736_v6 }
 0x252   : > { %v4103_v26 = vrot.slane %v4788_v21, %v5327_v53  ;;  %v4110_v30 = vrot.slane %v4789_v24, %v5327_v53  ;;  %v744_v14 = vld [vmem:[%s5292_s22 + $0xfb8] sm:$0xff]  ;;  %v4777_v48 = vcombine.high %v739_v11, %v743_v12  ;;  %v747_v18 = vld [vmem:[%s5292_s22 + $0xfd0] sm:$0xff]  ;;  %v774_v63 = vrot.slane %v5854_v35, %v773_v28 }
 0x253   : > { %v4779_v58 = vcombine.high %v740_v13, %v744_v14  ;;  %v752_v21 = vld [vmem:[%s5292_s22 + $0xff8] sm:$0xff]  ;;  %v4778_v24 = vcombine.low %v740_v13, %v744_v14 }
 0x254   : > { %3879 = vmatpush1.bf16.msra.mxu0 %v4720_v22  ;;  %v5881_v34 = vcombine.low %v4103_v26, %v4110_v30  ;;  %4043 = vmatpush1.bf16.msra.mxu1 %v4722_v25  ;;  %v4776_v22 = vcombine.low %v739_v11, %v743_v12  ;;  %v4785_v25 = vcombine.high %v747_v18, %v751_v19  ;;  %v777_v30 = vsub.s32 5, %v5320_v43 }
 0x255   : > { %3880 = vmatprep.subr.bf16.mxu0 %v4729_v5  ;;  %4044 = vmatprep.subr.bf16.mxu1 %v4731_v27  ;;  %v4787_v5 = vcombine.high %v748_v20, %v752_v21  ;;  %v4784_v26 = vcombine.low %v747_v18, %v751_v19  ;;  %v4786_v27 = vcombine.low %v748_v20, %v752_v21 }
 0x256   : > { %v4133_v60 = vrot.slane %v5881_v34, %v5327_v53 }
 0x258   : > { %3881 = vmatpush1.bf16.msra.mxu0 %v4728_v33  ;;  %4045 = vmatpush1.bf16.msra.mxu1 %v4730_v36  ;;  %v782_v33 = vrot.slane %v5854_v35, %v781_v59  ;;  %v778_v36 = vrot.slane %v5854_v35, %v777_v30 }
 0x259   : > { %3882 = vmatprep.subr.bf16.mxu0 %v4737_v37  ;;  %4046 = vmatprep.subr.bf16.mxu1 %v4739_v39  ;;  %v786_v37 = vrot.slane %v5854_v35, %v785_v31 }
 0x25c   : > { %3883 = vmatpush1.bf16.msra.mxu0 %v4736_v45  ;;  %4047 = vmatpush1.bf16.msra.mxu1 %v4738_v46 }
 0x25d   : > { %3884 = vmatprep.subr.bf16.mxu0 %v4745_v9  ;;  %4048 = vmatprep.subr.bf16.mxu1 %v4747_v47 }
 0x260   : > { %3885 = vmatpush1.bf16.msra.mxu0 %v4744_v54  ;;  %4049 = vmatpush1.bf16.msra.mxu1 %v4746_v55 }
 0x261   : > { %3886 = vmatprep.subr.bf16.mxu0 %v4753_v56  ;;  %4050 = vmatprep.subr.bf16.mxu1 %v4755_v23 }
 0x264   : > { %3887 = vmatpush1.bf16.msra.mxu0 %v4752_v0  ;;  %4051 = vmatpush1.bf16.msra.mxu1 %v4754_v1 }
 0x265   : > { %3888 = vmatprep.subr.bf16.mxu0 %v4761_v2  ;;  %4052 = vmatprep.subr.bf16.mxu1 %v4763_v3 }
 0x268   : > { %3889 = vmatpush1.bf16.msra.mxu0 %v4760_v7  ;;  %4053 = vmatpush1.bf16.msra.mxu1 %v4762_v38 }
 0x269   : > { %3890 = vmatprep.subr.bf16.mxu0 %v4769_v8  ;;  %4054 = vmatprep.subr.bf16.mxu1 %v4771_v10 }
 0x26c   : > { %3891 = vmatpush1.bf16.msra.mxu0 %v4768_v15  ;;  %4055 = vmatpush1.bf16.msra.mxu1 %v4770_v17 }
 0x26d   : > { %3892 = vmatprep.subr.bf16.mxu0 %v4777_v48  ;;  %4056 = vmatprep.subr.bf16.mxu1 %v4779_v58 }
 0x270   : > { %3893 = vmatpush1.bf16.msra.mxu0 %v4776_v22  ;;  %4057 = vmatpush1.bf16.msra.mxu1 %v4778_v24 }
 0x271   : > { %3894 = vmatprep.subr.bf16.mxu0 %v4785_v25  ;;  %4058 = vmatprep.subr.bf16.mxu1 %v4787_v5 }
 0x274   : > { %3895 = vmatpush1.bf16.msra.mxu0 %v4784_v26  ;;  %4059 = vmatpush1.bf16.msra.mxu1 %v4786_v27 }
 0x277   : > { %3897 = vmatmul.mubr.bf16.vlgmr.msra.gmra.mrb[4].mxu0 %v5622_v16  ;;  %4061 = vmatmul.mubr.bf16.vlgmr.msra.gmra.mrb[4].mxu1 %v5622_v16 }
 0x34a   : > { %v3898_v39 = vpop.f32.mrb[4].mxu0  ;;  %v4062_v41 = vpop.f32.mrb[4].mxu1 }
 0x34b   : > { %v4804_v40 = vadd.f32 %v3898_v39, %v774_v63  ;;  %v3900_v16 = vpop.f32.mrb[5].mxu0  ;;  %v4806_v42 = vadd.f32 %v4062_v41, %v782_v33  ;;  %v4064_v45 = vpop.f32.mrb[5].mxu1 }
 0x34c   : > { %v4805_v44 = vadd.f32 %v3900_v16, %v778_v36  ;;  %v3902_v46 = vpop.f32.mrb[6].mxu0  ;;  %v4807_v43 = vadd.f32 %v4064_v45, %v786_v37  ;;  %v4066_v47 = vpop.f32.mrb[6].mxu1 }
 0x34d   : > { %v4073_v9 = vmax.f32 %v4804_v40, 0.0  ;;  %v3903_v49 = vpop.f32.mrb[7].mxu0  ;;  %v4075_v50 = vmax.f32 %v4806_v42, 0.0  ;;  %v4067_v52 = vpop.f32.mrb[7].mxu1 }
 0x34e   : > { %v4074_v51 = vmax.f32 %v4805_v44, 0.0  ;;  %v4076_v54 = vmax.f32 %v4807_v43, 0.0 }
 0x350   : > { %v4790_v35 = vpack.c.bf16 %v4074_v51, %v4073_v9  ;;  %v4791_v55 = vpack.c.bf16 %v4076_v54, %v4075_v50 }
 0x352   : > { %v4117_v56 = vrot.slane %v4790_v35, %v5327_v53  ;;  %v4124_v23 = vrot.slane %v4791_v55, %v5327_v53 }
 0x354   : > { %v4126_v57 = vcombine.low %v4117_v56, %v4124_v23 }
 0x356   : > { %v4140_v61 = vrot.slane %v4126_v57, %v5327_v53 }
 0x358   : > { %v4141_v62 = vcombine.low %v4133_v60, %v4140_v61 }
 0x35a   : > { %4143 = vst [vmem:[%s236_s10] sm:$0xff] %v4141_v62 }
 0x35b   : > { %5024 = shalt.err (!%p5021_p1)
}
 0x35c   : > { %s5025_s8 = scalar_lea.hbm %s5928_s11, 128  ;;  %s5029_s29 = scalar_lea.hbm %s5975_s3, 256 }
 0x35d   : > { %p5026_p6 = scmp.ne.s32.totalorder %s5928_s11, %s5025_s8  ;;  %p5030_p7 = scmp.lt.u32.totalorder %s5928_s11, %s5975_s3 }
 0x35e   : > { %p5031_p9 = scmp.lt.u32.totalorder %s5029_s29, %s5025_s8  ;;  %p5033_p12 = scmp.lt.u32.totalorder %s5025_s8, %s5928_s11 }
 0x35f   : > { %p5027_p5 = pnand %p5026_p6, %p5996_p4 }
 0x360   : > { %p5032_p10 = por %p5031_p9, %p5030_p7 }
 0x361   : > { %p5028_p2 = pneg %p5027_p5 }
 0x362   : > { %p5034_p0 = por %p5033_p12, %p5032_p10 }
 0x364   : > { %p5035_p11 = pnand %p5034_p0, %p5028_p2 }
 0x366   : > { %5038 = shalt.err (!%p5035_p11)
}
 0x367   : > { %4864 = dma.vmem_to_hbm [thread:$0]  (%p5996_p4), %s5930_s20, 128, %s5928_s11, %s4145_s24  }
 0x368 PF: > { %s4171_s30 = sand.u32 1, %s5069_s12   ;;  %p5997_p13 = scmp.ne.s32.totalorder %s5986_s28, 0 }
 0x369   : > { %p5998_p3 = scmp.ge.s32.totalorder %s5081_s15, 2  ;;  %s4172_s27 = scalar_lea.sflag [#allocation4], %s4171_s30 }
 0x36b   : > { %p4878_p8 = pnand %p5998_p3, %p5997_p13 }
 0x36d   : > { %5064 = dma.done.wait (!%p4878_p8), %s4172_s27, 128  }
 0x36e   : > { %5066 = vsyncadd (!%p4878_p8), %s4172_s27, 4294967168  ;;  %p17_p1 = scmp.ge.s32.totalorder %s5132_s16, 4   ;;  %s5999_s12 = smov %s5073_s13 }
 0x36f   : > { %s6000_s13 = smov %s5077_s14  ;;  %s6001_s14 = smov %s5143_s19 }
 0x370   : > { %s6002_s15 = smov %s5132_s16  ;;  %19 = sbr.rel (!%p17_p1) target bundleno = 6 (0x6), region = 93 }
 0x377   :  { %4177 = vsyncpa [#allocation3], 1 }
 0x378   :  { %4179 = vsyncpa [#allocation3 + $0x1], 1 }
 0x379   :  { %4180 = vsyncpa [#allocation6], 1 }
 0x37a   :  { %4182 = vsyncpa [#allocation6 + $0x1], 1 }
 0x37b   :  { %4183 = vsyncpa [#allocation4], 1 }
 0x37c   :  { %4185 = vsyncpa [#allocation4 + $0x1], 1 }

</bundles_post_ra>
